<compile_context>
chip_gen: v6e
topology: v6e:2x2x1
jax: 0.10.0
libtpu: 0.0.40
codegen_flags: <defaults>
</compile_context>

<pallas_src>
import functools

import jax
import jax.numpy as jnp
from jax import lax
from jax.experimental import pallas as pl
from jax.experimental.pallas import tpu as pltpu

NEG_SLOPE = 0.01  # nn.LeakyReLU default


# ---------------------------------------------------------------------------
# Kernels
# ---------------------------------------------------------------------------

def _kernel_dense(x_ref, w_ref, b_ref, o_ref, patch_ref, *,
                  th, tch, w_dim, c_dim, n_out):
    """Lane-dense variant.

    x_ref:     (H+2, (W+2)*C)  padded image, lane-dense, resident across hb
    w_ref:     (9*C, Cout)     weight, im2col order (kh, kw, c) x cout
    b_ref:     (1, W*Cout)     bias tiled along W (lane-dense)
    o_ref:     (th, W*Cout)    lane-dense output rows for this (batch, h-block)
    patch_ref: (tch*W, 9*C)    VMEM scratch holding one chunk's im2col patch
    """
    hb = pl.program_id(1)
    row0 = hb * th
    if th % 8 == 0:
        row0 = pl.multiple_of(row0, 8)
    m = tch * w_dim
    n_chunks = th // tch

    def chunk(ci, carry):
        r0 = row0 + ci * tch
        if th % 8 == 0 and tch % 8 == 0:
            r0 = pl.multiple_of(r0, 8)
        # Assemble the (m, 9C) im2col patch in VMEM (9 static lane-offset stores).
        for t in range(9):
            kh, kw = divmod(t, 3)
            tap = x_ref[pl.ds(r0 + kh, tch),
                        pl.ds(kw * c_dim, w_dim * c_dim)]          # (tch, W*C)
            patch_ref[:, pl.ds(t * c_dim, c_dim)] = tap.reshape(m, c_dim)
        # One fused K=9C matmul on the MXU, f32 accumulate.
        acc = jnp.dot(patch_ref[...], w_ref[...],
                      preferred_element_type=jnp.float32)           # (m, Cout)
        # Relayout to the lane-dense output tile, then bias + LeakyReLU there
        # (4x fewer vregs than on the lane-padded (m, Cout) layout).
        y = acc.reshape(tch, w_dim * n_out) + b_ref[...]
        y = jnp.where(y >= 0, y, NEG_SLOPE * y)
        o_start = ci * tch
        if tch % 8 == 0:
            o_start = pl.multiple_of(o_start, 8)
        o_ref[pl.ds(o_start, tch), :] = y.astype(o_ref.dtype)
        return carry

    lax.fori_loop(0, n_chunks, chunk, 0, unroll=True)


def _kernel_safe(x_ref, w_ref, b_ref, o_ref, patch_ref, *, th, tch, w_dim, c_dim):
    """Conservative fallback (layouts of the previously-validated kernel).

    x_ref:     (H+2, W+2, C)   padded image (lane-padded residency)
    w_ref:     (9*C, Cout)
    b_ref:     (1, Cout)
    o_ref:     (th*W, Cout)
    patch_ref: (tch*W, 9*C)
    """
    hb = pl.program_id(1)
    row0 = hb * th
    if th % 8 == 0:
        row0 = pl.multiple_of(row0, 8)
    m = tch * w_dim

    def chunk(ci, carry):
        r0 = row0 + ci * tch
        for t in range(9):
            kh, kw = divmod(t, 3)
            tap = x_ref[pl.ds(r0 + kh, tch), pl.ds(kw, w_dim), :]   # (tch, W, C)
            patch_ref[:, pl.ds(t * c_dim, c_dim)] = tap.reshape(m, c_dim)
        acc = jnp.dot(patch_ref[...], w_ref[...],
                      preferred_element_type=jnp.float32)           # (m, Cout)
        y = acc + b_ref[...]
        y = jnp.where(y >= 0, y, NEG_SLOPE * y)
        o_start = ci * m
        if m % 8 == 0:
            o_start = pl.multiple_of(o_start, 8)
        o_ref[pl.ds(o_start, m), :] = y.astype(o_ref.dtype)
        return carry

    lax.fori_loop(0, th // tch, chunk, 0, unroll=True)


# ---------------------------------------------------------------------------
# Tiling / VMEM helpers
# ---------------------------------------------------------------------------

def _pick_th(H, W, target_rows):
    """Largest divisor th of H with th*W <= target_rows; th sublane-aligned or == H."""
    cands = [t for t in range(1, H + 1) if H % t == 0 and (t == H or t % 8 == 0)]
    fitting = [t for t in cands if t * W <= target_rows]
    return max(fitting) if fitting else min(cands)


def _pick_tch(th, W, chunk_rows):
    """Largest divisor of th whose chunk (tch*W rows) stays near the vreg-friendly target."""
    budget = max(chunk_rows, W)
    cands = [t for t in range(1, th + 1) if th % t == 0 and t * W <= budget]
    return max(cands) if cands else 1


def _round_up(n, m):
    return -(-n // m) * m


def _vmem_limit_bytes(H, W, C, Cout, th, tch, dense):
    f32 = 4
    if dense:
        x_blk = _round_up(H + 2, 8) * _round_up((W + 2) * C, 128) * f32
        o_blk = _round_up(th, 8) * _round_up(W * Cout, 128) * f32
        b_blk = 8 * _round_up(W * Cout, 128) * f32
    else:
        x_blk = (H + 2) * _round_up(W + 2, 8) * 128 * f32
        o_blk = _round_up(th * W, 8) * _round_up(Cout, 128) * f32
        b_blk = 8 * _round_up(Cout, 128) * f32
    w_blk = _round_up(9 * C, 8) * _round_up(Cout, 128) * f32
    patch = _round_up(tch * W, 8) * _round_up(9 * C, 128) * f32
    est = 2 * (x_blk + w_blk + b_blk + o_blk) + patch  # inputs/outputs double-buffered
    # generous headroom, capped below v7x's 64 MiB physical VMEM
    return int(min(64 * 2 ** 20, max(32 * 2 ** 20, 2 * est)))


# ---------------------------------------------------------------------------
# Wrappers
# ---------------------------------------------------------------------------

def _common_prep(x, weight):
    B, C, H, W = x.shape
    Cout = weight.shape[0]
    xt = jnp.transpose(x, (0, 2, 3, 1))                               # (B,H,W,C)
    xp = jnp.pad(xt, ((0, 0), (0, 0), (1, 1), (0, 0)), mode="wrap")   # circular W
    xp = jnp.pad(xp, ((0, 0), (1, 1), (0, 0), (0, 0)))                # zero H
    w2 = jnp.transpose(weight, (2, 3, 1, 0)).reshape(9 * C, Cout)     # (9C, Cout)
    return xp, w2


@functools.partial(jax.jit, static_argnames=("th", "tch"))
def _input_proj_dense(x, weight, bias, *, th, tch):
    B, C, H, W = x.shape
    Cout = weight.shape[0]
    xp, w2 = _common_prep(x, weight)
    x_dense = xp.reshape(B, H + 2, (W + 2) * C)                       # lane-dense input
    b_wide = jnp.tile(bias, W).reshape(1, W * Cout)                   # lane-dense bias

    kernel = functools.partial(_kernel_dense, th=th, tch=tch,
                               w_dim=W, c_dim=C, n_out=Cout)
    out = pl.pallas_call(
        kernel,
        out_shape=jax.ShapeDtypeStruct((B, H, W * Cout), x.dtype),
        grid_spec=pltpu.PrefetchScalarGridSpec(
            num_scalar_prefetch=0,
            grid=(B, H // th),
            in_specs=[
                # whole padded image per batch; constant in hb -> stays resident
                pl.BlockSpec((None, H + 2, (W + 2) * C), lambda b, hb: (b, 0, 0)),
                pl.BlockSpec((9 * C, Cout), lambda b, hb: (0, 0)),
                pl.BlockSpec((1, W * Cout), lambda b, hb: (0, 0)),
            ],
            out_specs=pl.BlockSpec((None, th, W * Cout), lambda b, hb: (b, hb, 0)),
            scratch_shapes=[pltpu.VMEM((tch * W, 9 * C), jnp.float32)],
        ),
        compiler_params=pltpu.CompilerParams(
            dimension_semantics=("parallel", "parallel"),
            vmem_limit_bytes=_vmem_limit_bytes(H, W, C, Cout, th, tch, True),
        ),
    )(x_dense, w2, b_wide)
    return out.reshape(B, H * W, Cout)   # same contiguous bytes: free


@functools.partial(jax.jit, static_argnames=("th", "tch"))
def _input_proj_safe(x, weight, bias, *, th, tch):
    B, C, H, W = x.shape
    Cout = weight.shape[0]
    xp, w2 = _common_prep(x, weight)
    b_row = bias.reshape(1, Cout)

    kernel = functools.partial(_kernel_safe, th=th, tch=tch, w_dim=W, c_dim=C)
    out = pl.pallas_call(
        kernel,
        out_shape=jax.ShapeDtypeStruct((B, H * W, Cout), x.dtype),
        grid_spec=pltpu.PrefetchScalarGridSpec(
            num_scalar_prefetch=0,
            grid=(B, H // th),
            in_specs=[
                pl.BlockSpec((None, H + 2, W + 2, C), lambda b, hb: (b, 0, 0, 0)),
                pl.BlockSpec((9 * C, Cout), lambda b, hb: (0, 0)),
                pl.BlockSpec((1, Cout), lambda b, hb: (0, 0)),
            ],
            out_specs=pl.BlockSpec((None, th * W, Cout), lambda b, hb: (b, hb, 0)),
            scratch_shapes=[pltpu.VMEM((tch * W, 9 * C), jnp.float32)],
        ),
        compiler_params=pltpu.CompilerParams(
            dimension_semantics=("parallel", "parallel"),
            vmem_limit_bytes=_vmem_limit_bytes(H, W, C, Cout, th, tch, False),
        ),
    )(xp, w2, b_row)
    return out


_IMPL_OK = {}  # (shape/tile key) -> lane-dense variant compiled & ran


def input_proj(x, weight, bias, *, target_rows=4096, chunk_rows=512):
    """Equivalent of InputProj.forward.

    x: (B, C, H, W) f32; weight: (Cout, C, 3, 3); bias: (Cout,)
    returns (B, H*W, Cout)
    """
    B, C, H, W = x.shape
    Cout = weight.shape[0]
    th = _pick_th(H, W, target_rows)
    tch = _pick_tch(th, W, chunk_rows)
    key = (B, C, H, W, Cout, th, tch)

    # Lane-dense path only pays / is only attempted when the output tile's
    # minor dim is a clean multiple of 128 (review guard); otherwise fall back.
    want_dense = (W * Cout) % 128 == 0
    if want_dense and _IMPL_OK.get(key, True):
        try:
            out = _input_proj_dense(x, weight, bias, th=th, tch=tch)
            if key not in _IMPL_OK:
                out = jax.block_until_ready(out)   # surface compile/run issues once
                _IMPL_OK[key] = True
            return out
        except Exception:
            _IMPL_OK[key] = False                  # toolchain rejected relayout; fall back
    return _input_proj_safe(x, weight, bias, th=th, tch=tch)


# ---------------------------------------------------------------------------
# Reference + self-test
# ---------------------------------------------------------------------------

def _reference(x, weight, bias):
    """Pure-JAX reference mirroring the PyTorch forward."""
    B, C, H, W = x.shape
    xp = jnp.pad(x, ((0, 0), (0, 0), (0, 0), (1, 1)), mode="wrap")
    xp = jnp.pad(xp, ((0, 0), (0, 0), (1, 1), (0, 0)))
    y = lax.conv_general_dilated(
        xp, weight, window_strides=(1, 1), padding="VALID",
        dimension_numbers=("NCHW", "OIHW", "NCHW"),
    ) + bias.reshape(1, -1, 1, 1)
    y = jnp.where(y >= 0, y, NEG_SLOPE * y)
    return jnp.transpose(y.reshape(B, y.shape[1], H * W), (0, 2, 1))


if __name__ == "__main__":
    B, C, H, W = 2, 4, 16, 16
    Cout = 32

    key = jax.random.PRNGKey(0)
    kx, kwt, kb = jax.random.split(key, 3)
    x = jax.random.normal(kx, (B, C, H, W), dtype=jnp.float32)
    # deterministic parameter init (Conv2d-like fan-in scaling)
    fan_in = C * 3 * 3
    bound = 1.0 / (fan_in ** 0.5)
    weight = jax.random.uniform(kwt, (Cout, C, 3, 3), jnp.float32, -bound, bound)
    bias = jax.random.uniform(kb, (Cout,), jnp.float32, -bound, bound)

    out = input_proj(x, weight, bias)
    out = jax.block_until_ready(out)

    ref = _reference(x, weight, bias)
    assert out.shape == (B, H * W, Cout), out.shape
    err = float(jnp.max(jnp.abs(out - ref)))
    assert jnp.allclose(out, ref, atol=1e-4, rtol=1e-4), err

    print("KERNEL_OK")
</pallas_src>

<mosaic_0001>
module attributes {stable_mosaic.version = 11 : i64} {
  func.func @_kernel_dense(%arg0: i32, %arg1: i32, %arg2: memref<1x18x72xf32, #tpu.memory_space<vmem>>, %arg3: memref<36x32xf32, #tpu.memory_space<vmem>>, %arg4: memref<1x512xf32, #tpu.memory_space<vmem>>, %arg5: memref<1x16x512xf32, #tpu.memory_space<vmem>>, %arg6: memref<256x36xf32, #tpu.memory_space<vmem>>) attributes {dimension_semantics = [#tpu.dimension_semantics<parallel>, #tpu.dimension_semantics<parallel>], iteration_bounds = array<i64: 2, 1>, scalar_prefetch = 0 : i64, scratch_operands = 1 : i64, tpu.core_type = #tpu.core_type<tc>, window_params = [{transform_indices = @transform_0, window_bounds = array<i64: 1, 18, 72>}, {pipeline_mode = #tpu.pipeline_mode<synchronous>, transform_indices = @transform_1, window_bounds = array<i64: 36, 32>}, {pipeline_mode = #tpu.pipeline_mode<synchronous>, transform_indices = @transform_2, window_bounds = array<i64: 1, 512>}, {transform_indices = @transform_3, window_bounds = array<i64: 1, 16, 512>}]} {
    %c16_i32 = arith.constant 16 : i32
    %0 = arith.muli %arg1, %c16_i32 : i32
    %1 = tpu.assume_multiple %0, 8 : i32
    %c0_i32 = arith.constant 0 : i32
    %c16_i32_0 = arith.constant 16 : i32
    %2 = arith.muli %c0_i32, %c16_i32_0 : i32
    %3 = arith.addi %1, %2 : i32
    %4 = tpu.assume_multiple %3, 8 : i32
    %c0_i32_1 = arith.constant 0 : i32
    %5 = arith.addi %4, %c0_i32_1 : i32
    %c0 = arith.constant 0 : index
    %6 = arith.index_cast %5 : i32 to index
    %c0_2 = arith.constant 0 : index
    %7 = vector.load %arg2[%c0, %6, %c0_2] : memref<1x18x72xf32, #tpu.memory_space<vmem>>, vector<1x16x64xf32>
    %8 = vector.shape_cast %7 : vector<1x16x64xf32> to vector<16x64xf32>
    %9 = vector.shape_cast %8 : vector<16x64xf32> to vector<256x4xf32>
    %c0_3 = arith.constant 0 : index
    %c0_4 = arith.constant 0 : index
    %10 = vector.load %arg6[%c0_3, %c0_4] : memref<256x36xf32, #tpu.memory_space<vmem>>, vector<256x4xf32>
    tpu.vector_store %arg6[%c0_3, %c0_4], %9 {strides = array<i32>} : memref<256x36xf32, #tpu.memory_space<vmem>>, vector<256x4xf32>,
    %c0_i32_5 = arith.constant 0 : i32
    %11 = arith.addi %4, %c0_i32_5 : i32
    %c0_6 = arith.constant 0 : index
    %12 = arith.index_cast %11 : i32 to index
    %c4 = arith.constant 4 : index
    %13 = vector.load %arg2[%c0_6, %12, %c4] : memref<1x18x72xf32, #tpu.memory_space<vmem>>, vector<1x16x64xf32>
    %14 = vector.shape_cast %13 : vector<1x16x64xf32> to vector<16x64xf32>
    %15 = vector.shape_cast %14 : vector<16x64xf32> to vector<256x4xf32>
    %c0_7 = arith.constant 0 : index
    %c4_8 = arith.constant 4 : index
    %16 = vector.load %arg6[%c0_7, %c4_8] : memref<256x36xf32, #tpu.memory_space<vmem>>, vector<256x4xf32>
    tpu.vector_store %arg6[%c0_7, %c4_8], %15 {strides = array<i32>} : memref<256x36xf32, #tpu.memory_space<vmem>>, vector<256x4xf32>,
    %c0_i32_9 = arith.constant 0 : i32
    %17 = arith.addi %4, %c0_i32_9 : i32
    %c0_10 = arith.constant 0 : index
    %18 = arith.index_cast %17 : i32 to index
    %c8 = arith.constant 8 : index
    %19 = vector.load %arg2[%c0_10, %18, %c8] : memref<1x18x72xf32, #tpu.memory_space<vmem>>, vector<1x16x64xf32>
    %20 = vector.shape_cast %19 : vector<1x16x64xf32> to vector<16x64xf32>
    %21 = vector.shape_cast %20 : vector<16x64xf32> to vector<256x4xf32>
    %c0_11 = arith.constant 0 : index
    %c8_12 = arith.constant 8 : index
    %22 = vector.load %arg6[%c0_11, %c8_12] : memref<256x36xf32, #tpu.memory_space<vmem>>, vector<256x4xf32>
    tpu.vector_store %arg6[%c0_11, %c8_12], %21 {strides = array<i32>} : memref<256x36xf32, #tpu.memory_space<vmem>>, vector<256x4xf32>,
    %c1_i32 = arith.constant 1 : i32
    %23 = arith.addi %4, %c1_i32 : i32
    %c0_13 = arith.constant 0 : index
    %24 = arith.index_cast %23 : i32 to index
    %c0_14 = arith.constant 0 : index
    %25 = vector.load %arg2[%c0_13, %24, %c0_14] : memref<1x18x72xf32, #tpu.memory_space<vmem>>, vector<1x16x64xf32>
    %26 = vector.shape_cast %25 : vector<1x16x64xf32> to vector<16x64xf32>
    %27 = vector.shape_cast %26 : vector<16x64xf32> to vector<256x4xf32>
    %c0_15 = arith.constant 0 : index
    %c12 = arith.constant 12 : index
    %28 = vector.load %arg6[%c0_15, %c12] : memref<256x36xf32, #tpu.memory_space<vmem>>, vector<256x4xf32>
    tpu.vector_store %arg6[%c0_15, %c12], %27 {strides = array<i32>} : memref<256x36xf32, #tpu.memory_space<vmem>>, vector<256x4xf32>,
    %c1_i32_16 = arith.constant 1 : i32
    %29 = arith.addi %4, %c1_i32_16 : i32
    %c0_17 = arith.constant 0 : index
    %30 = arith.index_cast %29 : i32 to index
    %c4_18 = arith.constant 4 : index
    %31 = vector.load %arg2[%c0_17, %30, %c4_18] : memref<1x18x72xf32, #tpu.memory_space<vmem>>, vector<1x16x64xf32>
    %32 = vector.shape_cast %31 : vector<1x16x64xf32> to vector<16x64xf32>
    %33 = vector.shape_cast %32 : vector<16x64xf32> to vector<256x4xf32>
    %c0_19 = arith.constant 0 : index
    %c16 = arith.constant 16 : index
    %34 = vector.load %arg6[%c0_19, %c16] : memref<256x36xf32, #tpu.memory_space<vmem>>, vector<256x4xf32>
    tpu.vector_store %arg6[%c0_19, %c16], %33 {strides = array<i32>} : memref<256x36xf32, #tpu.memory_space<vmem>>, vector<256x4xf32>,
    %c1_i32_20 = arith.constant 1 : i32
    %35 = arith.addi %4, %c1_i32_20 : i32
    %c0_21 = arith.constant 0 : index
    %36 = arith.index_cast %35 : i32 to index
    %c8_22 = arith.constant 8 : index
    %37 = vector.load %arg2[%c0_21, %36, %c8_22] : memref<1x18x72xf32, #tpu.memory_space<vmem>>, vector<1x16x64xf32>
    %38 = vector.shape_cast %37 : vector<1x16x64xf32> to vector<16x64xf32>
    %39 = vector.shape_cast %38 : vector<16x64xf32> to vector<256x4xf32>
    %c0_23 = arith.constant 0 : index
    %c20 = arith.constant 20 : index
    %40 = vector.load %arg6[%c0_23, %c20] : memref<256x36xf32, #tpu.memory_space<vmem>>, vector<256x4xf32>
    tpu.vector_store %arg6[%c0_23, %c20], %39 {strides = array<i32>} : memref<256x36xf32, #tpu.memory_space<vmem>>, vector<256x4xf32>,
    %c2_i32 = arith.constant 2 : i32
    %41 = arith.addi %4, %c2_i32 : i32
    %c0_24 = arith.constant 0 : index
    %42 = arith.index_cast %41 : i32 to index
    %c0_25 = arith.constant 0 : index
    %43 = vector.load %arg2[%c0_24, %42, %c0_25] : memref<1x18x72xf32, #tpu.memory_space<vmem>>, vector<1x16x64xf32>
    %44 = vector.shape_cast %43 : vector<1x16x64xf32> to vector<16x64xf32>
    %45 = vector.shape_cast %44 : vector<16x64xf32> to vector<256x4xf32>
    %c0_26 = arith.constant 0 : index
    %c24 = arith.constant 24 : index
    %46 = vector.load %arg6[%c0_26, %c24] : memref<256x36xf32, #tpu.memory_space<vmem>>, vector<256x4xf32>
    tpu.vector_store %arg6[%c0_26, %c24], %45 {strides = array<i32>} : memref<256x36xf32, #tpu.memory_space<vmem>>, vector<256x4xf32>,
    %c2_i32_27 = arith.constant 2 : i32
    %47 = arith.addi %4, %c2_i32_27 : i32
    %c0_28 = arith.constant 0 : index
    %48 = arith.index_cast %47 : i32 to index
    %c4_29 = arith.constant 4 : index
    %49 = vector.load %arg2[%c0_28, %48, %c4_29] : memref<1x18x72xf32, #tpu.memory_space<vmem>>, vector<1x16x64xf32>
    %50 = vector.shape_cast %49 : vector<1x16x64xf32> to vector<16x64xf32>
    %51 = vector.shape_cast %50 : vector<16x64xf32> to vector<256x4xf32>
    %c0_30 = arith.constant 0 : index
    %c28 = arith.constant 28 : index
    %52 = vector.load %arg6[%c0_30, %c28] : memref<256x36xf32, #tpu.memory_space<vmem>>, vector<256x4xf32>
    tpu.vector_store %arg6[%c0_30, %c28], %51 {strides = array<i32>} : memref<256x36xf32, #tpu.memory_space<vmem>>, vector<256x4xf32>,
    %c2_i32_31 = arith.constant 2 : i32
    %53 = arith.addi %4, %c2_i32_31 : i32
    %c0_32 = arith.constant 0 : index
    %54 = arith.index_cast %53 : i32 to index
    %c8_33 = arith.constant 8 : index
    %55 = vector.load %arg2[%c0_32, %54, %c8_33] : memref<1x18x72xf32, #tpu.memory_space<vmem>>, vector<1x16x64xf32>
    %56 = vector.shape_cast %55 : vector<1x16x64xf32> to vector<16x64xf32>
    %57 = vector.shape_cast %56 : vector<16x64xf32> to vector<256x4xf32>
    %c0_34 = arith.constant 0 : index
    %c32 = arith.constant 32 : index
    %58 = vector.load %arg6[%c0_34, %c32] : memref<256x36xf32, #tpu.memory_space<vmem>>, vector<256x4xf32>
    tpu.vector_store %arg6[%c0_34, %c32], %57 {strides = array<i32>} : memref<256x36xf32, #tpu.memory_space<vmem>>, vector<256x4xf32>,
    %c0_35 = arith.constant 0 : index
    %c0_36 = arith.constant 0 : index
    %59 = vector.load %arg6[%c0_35, %c0_36] : memref<256x36xf32, #tpu.memory_space<vmem>>, vector<256x36xf32>
    %c0_37 = arith.constant 0 : index
    %c0_38 = arith.constant 0 : index
    %60 = vector.load %arg3[%c0_37, %c0_38] : memref<36x32xf32, #tpu.memory_space<vmem>>, vector<36x32xf32>
    %cst = arith.constant dense<0.000000e+00> : vector<256x32xf32>
    %61 = tpu.matmul %59, %60, %cst {dimension_numbers = #tpu.dot_dimension_numbers<[1], [0], [0], [1], [0, 0, 1, 1], [], []>} : vector<256x36xf32>, vector<36x32xf32>, vector<256x32xf32> -> vector<256x32xf32>
    %62 = vector.shape_cast %61 : vector<256x32xf32> to vector<16x512xf32>
    %c0_39 = arith.constant 0 : index
    %c0_40 = arith.constant 0 : index
    %63 = vector.load %arg4[%c0_39, %c0_40] : memref<1x512xf32, #tpu.memory_space<vmem>>, vector<1x512xf32>
    %64 = vector.broadcast %63 : vector<1x512xf32> to vector<16x512xf32>
    %65 = arith.addf %62, %64 : vector<16x512xf32>
    %cst_41 = arith.constant 0.000000e+00 : f32
    %66 = vector.broadcast %cst_41 : f32 to vector<16x512xf32>
    %67 = arith.cmpf oge, %65, %66 : vector<16x512xf32>
    %cst_42 = arith.constant 0.00999999977 : f32
    %68 = vector.broadcast %cst_42 : f32 to vector<16x512xf32>
    %69 = arith.mulf %68, %65 : vector<16x512xf32>
    %70 = arith.select %67, %65, %69 : vector<16x512xi1>, vector<16x512xf32>
    %c16_i32_43 = arith.constant 16 : i32
    %71 = arith.muli %c0_i32, %c16_i32_43 : i32
    %72 = tpu.assume_multiple %71, 8 : i32
    %c0_44 = arith.constant 0 : index
    %73 = arith.index_cast %72 : i32 to index
    %c0_45 = arith.constant 0 : index
    %74 = vector.load %arg5[%c0_44, %73, %c0_45] : memref<1x16x512xf32, #tpu.memory_space<vmem>>, vector<1x16x512xf32>
    %75 = vector.shape_cast %74 : vector<1x16x512xf32> to vector<16x512xf32>
    %76 = vector.shape_cast %70 : vector<16x512xf32> to vector<1x16x512xf32>
    tpu.vector_store %arg5[%c0_44, %73, %c0_45], %76 {strides = array<i32>} : memref<1x16x512xf32, #tpu.memory_space<vmem>>, vector<1x16x512xf32>,
    %c1_i32_46 = arith.constant 1 : i32
    return
  }
  func.func @transform_0(%arg0: i32, %arg1: i32) -> (i32, i32, i32) {
    %c0_i32 = arith.constant 0 : i32
    %c0_i32_0 = arith.constant 0 : i32
    %c0_i32_1 = arith.constant 0 : i32
    return %arg0, %c0_i32, %c0_i32_0 : i32, i32, i32
  }
  func.func @transform_1(%arg0: i32, %arg1: i32) -> (i32, i32) {
    %c0_i32 = arith.constant 0 : i32
    %c0_i32_0 = arith.constant 0 : i32
    %c0_i32_1 = arith.constant 0 : i32
    return %c0_i32, %c0_i32_0 : i32, i32
  }
  func.func @transform_2(%arg0: i32, %arg1: i32) -> (i32, i32) {
    %c0_i32 = arith.constant 0 : i32
    %c0_i32_0 = arith.constant 0 : i32
    %c0_i32_1 = arith.constant 0 : i32
    return %c0_i32, %c0_i32_0 : i32, i32
  }
  func.func @transform_3(%arg0: i32, %arg1: i32) -> (i32, i32, i32) {
    %c0_i32 = arith.constant 0 : i32
    %c0_i32_0 = arith.constant 0 : i32
    return %arg0, %arg1, %c0_i32 : i32, i32, i32
  }
}

module attributes {stable_mosaic.version = 11 : i64} {
  func.func @_kernel_safe(%arg0: i32, %arg1: i32, %arg2: memref<1x18x18x4xf32, #tpu.memory_space<vmem>>, %arg3: memref<36x32xf32, #tpu.memory_space<vmem>>, %arg4: memref<1x32xf32, #tpu.memory_space<vmem>>, %arg5: memref<1x256x32xf32, #tpu.memory_space<vmem>>, %arg6: memref<256x36xf32, #tpu.memory_space<vmem>>) attributes {dimension_semantics = [#tpu.dimension_semantics<parallel>, #tpu.dimension_semantics<parallel>], iteration_bounds = array<i64: 2, 1>, scalar_prefetch = 0 : i64, scratch_operands = 1 : i64, tpu.core_type = #tpu.core_type<tc>, window_params = [{transform_indices = @transform_0, window_bounds = array<i64: 1, 18, 18, 4>}, {pipeline_mode = #tpu.pipeline_mode<synchronous>, transform_indices = @transform_1, window_bounds = array<i64: 36, 32>}, {pipeline_mode = #tpu.pipeline_mode<synchronous>, transform_indices = @transform_2, window_bounds = array<i64: 1, 32>}, {transform_indices = @transform_3, window_bounds = array<i64: 1, 256, 32>}]} {
    %c16_i32 = arith.constant 16 : i32
    %0 = arith.muli %arg1, %c16_i32 : i32
    %1 = tpu.assume_multiple %0, 8 : i32
    %c0_i32 = arith.constant 0 : i32
    %c16_i32_0 = arith.constant 16 : i32
    %2 = arith.muli %c0_i32, %c16_i32_0 : i32
    %3 = arith.addi %1, %2 : i32
    %c0_i32_1 = arith.constant 0 : i32
    %4 = arith.addi %3, %c0_i32_1 : i32
    %c0 = arith.constant 0 : index
    %5 = arith.index_cast %4 : i32 to index
    %c0_2 = arith.constant 0 : index
    %c0_3 = arith.constant 0 : index
    %6 = vector.load %arg2[%c0, %5, %c0_2, %c0_3] : memref<1x18x18x4xf32, #tpu.memory_space<vmem>>, vector<1x16x16x4xf32>
    %7 = vector.shape_cast %6 : vector<1x16x16x4xf32> to vector<16x16x4xf32>
    %8 = vector.shape_cast %7 : vector<16x16x4xf32> to vector<256x4xf32>
    %c0_4 = arith.constant 0 : index
    %c0_5 = arith.constant 0 : index
    %9 = vector.load %arg6[%c0_4, %c0_5] : memref<256x36xf32, #tpu.memory_space<vmem>>, vector<256x4xf32>
    tpu.vector_store %arg6[%c0_4, %c0_5], %8 {strides = array<i32>} : memref<256x36xf32, #tpu.memory_space<vmem>>, vector<256x4xf32>,
    %c0_i32_6 = arith.constant 0 : i32
    %10 = arith.addi %3, %c0_i32_6 : i32
    %c0_7 = arith.constant 0 : index
    %11 = arith.index_cast %10 : i32 to index
    %c1 = arith.constant 1 : index
    %c0_8 = arith.constant 0 : index
    %12 = vector.load %arg2[%c0_7, %11, %c1, %c0_8] : memref<1x18x18x4xf32, #tpu.memory_space<vmem>>, vector<1x16x16x4xf32>
    %13 = vector.shape_cast %12 : vector<1x16x16x4xf32> to vector<16x16x4xf32>
    %14 = vector.shape_cast %13 : vector<16x16x4xf32> to vector<256x4xf32>
    %c0_9 = arith.constant 0 : index
    %c4 = arith.constant 4 : index
    %15 = vector.load %arg6[%c0_9, %c4] : memref<256x36xf32, #tpu.memory_space<vmem>>, vector<256x4xf32>
    tpu.vector_store %arg6[%c0_9, %c4], %14 {strides = array<i32>} : memref<256x36xf32, #tpu.memory_space<vmem>>, vector<256x4xf32>,
    %c0_i32_10 = arith.constant 0 : i32
    %16 = arith.addi %3, %c0_i32_10 : i32
    %c0_11 = arith.constant 0 : index
    %17 = arith.index_cast %16 : i32 to index
    %c2 = arith.constant 2 : index
    %c0_12 = arith.constant 0 : index
    %18 = vector.load %arg2[%c0_11, %17, %c2, %c0_12] : memref<1x18x18x4xf32, #tpu.memory_space<vmem>>, vector<1x16x16x4xf32>
    %19 = vector.shape_cast %18 : vector<1x16x16x4xf32> to vector<16x16x4xf32>
    %20 = vector.shape_cast %19 : vector<16x16x4xf32> to vector<256x4xf32>
    %c0_13 = arith.constant 0 : index
    %c8 = arith.constant 8 : index
    %21 = vector.load %arg6[%c0_13, %c8] : memref<256x36xf32, #tpu.memory_space<vmem>>, vector<256x4xf32>
    tpu.vector_store %arg6[%c0_13, %c8], %20 {strides = array<i32>} : memref<256x36xf32, #tpu.memory_space<vmem>>, vector<256x4xf32>,
    %c1_i32 = arith.constant 1 : i32
    %22 = arith.addi %3, %c1_i32 : i32
    %c0_14 = arith.constant 0 : index
    %23 = arith.index_cast %22 : i32 to index
    %c0_15 = arith.constant 0 : index
    %c0_16 = arith.constant 0 : index
    %24 = vector.load %arg2[%c0_14, %23, %c0_15, %c0_16] : memref<1x18x18x4xf32, #tpu.memory_space<vmem>>, vector<1x16x16x4xf32>
    %25 = vector.shape_cast %24 : vector<1x16x16x4xf32> to vector<16x16x4xf32>
    %26 = vector.shape_cast %25 : vector<16x16x4xf32> to vector<256x4xf32>
    %c0_17 = arith.constant 0 : index
    %c12 = arith.constant 12 : index
    %27 = vector.load %arg6[%c0_17, %c12] : memref<256x36xf32, #tpu.memory_space<vmem>>, vector<256x4xf32>
    tpu.vector_store %arg6[%c0_17, %c12], %26 {strides = array<i32>} : memref<256x36xf32, #tpu.memory_space<vmem>>, vector<256x4xf32>,
    %c1_i32_18 = arith.constant 1 : i32
    %28 = arith.addi %3, %c1_i32_18 : i32
    %c0_19 = arith.constant 0 : index
    %29 = arith.index_cast %28 : i32 to index
    %c1_20 = arith.constant 1 : index
    %c0_21 = arith.constant 0 : index
    %30 = vector.load %arg2[%c0_19, %29, %c1_20, %c0_21] : memref<1x18x18x4xf32, #tpu.memory_space<vmem>>, vector<1x16x16x4xf32>
    %31 = vector.shape_cast %30 : vector<1x16x16x4xf32> to vector<16x16x4xf32>
    %32 = vector.shape_cast %31 : vector<16x16x4xf32> to vector<256x4xf32>
    %c0_22 = arith.constant 0 : index
    %c16 = arith.constant 16 : index
    %33 = vector.load %arg6[%c0_22, %c16] : memref<256x36xf32, #tpu.memory_space<vmem>>, vector<256x4xf32>
    tpu.vector_store %arg6[%c0_22, %c16], %32 {strides = array<i32>} : memref<256x36xf32, #tpu.memory_space<vmem>>, vector<256x4xf32>,
    %c1_i32_23 = arith.constant 1 : i32
    %34 = arith.addi %3, %c1_i32_23 : i32
    %c0_24 = arith.constant 0 : index
    %35 = arith.index_cast %34 : i32 to index
    %c2_25 = arith.constant 2 : index
    %c0_26 = arith.constant 0 : index
    %36 = vector.load %arg2[%c0_24, %35, %c2_25, %c0_26] : memref<1x18x18x4xf32, #tpu.memory_space<vmem>>, vector<1x16x16x4xf32>
    %37 = vector.shape_cast %36 : vector<1x16x16x4xf32> to vector<16x16x4xf32>
    %38 = vector.shape_cast %37 : vector<16x16x4xf32> to vector<256x4xf32>
    %c0_27 = arith.constant 0 : index
    %c20 = arith.constant 20 : index
    %39 = vector.load %arg6[%c0_27, %c20] : memref<256x36xf32, #tpu.memory_space<vmem>>, vector<256x4xf32>
    tpu.vector_store %arg6[%c0_27, %c20], %38 {strides = array<i32>} : memref<256x36xf32, #tpu.memory_space<vmem>>, vector<256x4xf32>,
    %c2_i32 = arith.constant 2 : i32
    %40 = arith.addi %3, %c2_i32 : i32
    %c0_28 = arith.constant 0 : index
    %41 = arith.index_cast %40 : i32 to index
    %c0_29 = arith.constant 0 : index
    %c0_30 = arith.constant 0 : index
    %42 = vector.load %arg2[%c0_28, %41, %c0_29, %c0_30] : memref<1x18x18x4xf32, #tpu.memory_space<vmem>>, vector<1x16x16x4xf32>
    %43 = vector.shape_cast %42 : vector<1x16x16x4xf32> to vector<16x16x4xf32>
    %44 = vector.shape_cast %43 : vector<16x16x4xf32> to vector<256x4xf32>
    %c0_31 = arith.constant 0 : index
    %c24 = arith.constant 24 : index
    %45 = vector.load %arg6[%c0_31, %c24] : memref<256x36xf32, #tpu.memory_space<vmem>>, vector<256x4xf32>
    tpu.vector_store %arg6[%c0_31, %c24], %44 {strides = array<i32>} : memref<256x36xf32, #tpu.memory_space<vmem>>, vector<256x4xf32>,
    %c2_i32_32 = arith.constant 2 : i32
    %46 = arith.addi %3, %c2_i32_32 : i32
    %c0_33 = arith.constant 0 : index
    %47 = arith.index_cast %46 : i32 to index
    %c1_34 = arith.constant 1 : index
    %c0_35 = arith.constant 0 : index
    %48 = vector.load %arg2[%c0_33, %47, %c1_34, %c0_35] : memref<1x18x18x4xf32, #tpu.memory_space<vmem>>, vector<1x16x16x4xf32>
    %49 = vector.shape_cast %48 : vector<1x16x16x4xf32> to vector<16x16x4xf32>
    %50 = vector.shape_cast %49 : vector<16x16x4xf32> to vector<256x4xf32>
    %c0_36 = arith.constant 0 : index
    %c28 = arith.constant 28 : index
    %51 = vector.load %arg6[%c0_36, %c28] : memref<256x36xf32, #tpu.memory_space<vmem>>, vector<256x4xf32>
    tpu.vector_store %arg6[%c0_36, %c28], %50 {strides = array<i32>} : memref<256x36xf32, #tpu.memory_space<vmem>>, vector<256x4xf32>,
    %c2_i32_37 = arith.constant 2 : i32
    %52 = arith.addi %3, %c2_i32_37 : i32
    %c0_38 = arith.constant 0 : index
    %53 = arith.index_cast %52 : i32 to index
    %c2_39 = arith.constant 2 : index
    %c0_40 = arith.constant 0 : index
    %54 = vector.load %arg2[%c0_38, %53, %c2_39, %c0_40] : memref<1x18x18x4xf32, #tpu.memory_space<vmem>>, vector<1x16x16x4xf32>
    %55 = vector.shape_cast %54 : vector<1x16x16x4xf32> to vector<16x16x4xf32>
    %56 = vector.shape_cast %55 : vector<16x16x4xf32> to vector<256x4xf32>
    %c0_41 = arith.constant 0 : index
    %c32 = arith.constant 32 : index
    %57 = vector.load %arg6[%c0_41, %c32] : memref<256x36xf32, #tpu.memory_space<vmem>>, vector<256x4xf32>
    tpu.vector_store %arg6[%c0_41, %c32], %56 {strides = array<i32>} : memref<256x36xf32, #tpu.memory_space<vmem>>, vector<256x4xf32>,
    %c0_42 = arith.constant 0 : index
    %c0_43 = arith.constant 0 : index
    %58 = vector.load %arg6[%c0_42, %c0_43] : memref<256x36xf32, #tpu.memory_space<vmem>>, vector<256x36xf32>
    %c0_44 = arith.constant 0 : index
    %c0_45 = arith.constant 0 : index
    %59 = vector.load %arg3[%c0_44, %c0_45] : memref<36x32xf32, #tpu.memory_space<vmem>>, vector<36x32xf32>
    %cst = arith.constant dense<0.000000e+00> : vector<256x32xf32>
    %60 = tpu.matmul %58, %59, %cst {dimension_numbers = #tpu.dot_dimension_numbers<[1], [0], [0], [1], [0, 0, 1, 1], [], []>} : vector<256x36xf32>, vector<36x32xf32>, vector<256x32xf32> -> vector<256x32xf32>
    %c0_46 = arith.constant 0 : index
    %c0_47 = arith.constant 0 : index
    %61 = vector.load %arg4[%c0_46, %c0_47] : memref<1x32xf32, #tpu.memory_space<vmem>>, vector<1x32xf32>
    %62 = vector.broadcast %61 : vector<1x32xf32> to vector<256x32xf32>
    %63 = arith.addf %60, %62 : vector<256x32xf32>
    %cst_48 = arith.constant 0.000000e+00 : f32
    %64 = vector.broadcast %cst_48 : f32 to vector<256x32xf32>
    %65 = arith.cmpf oge, %63, %64 : vector<256x32xf32>
    %cst_49 = arith.constant 0.00999999977 : f32
    %66 = vector.broadcast %cst_49 : f32 to vector<256x32xf32>
    %67 = arith.mulf %66, %63 : vector<256x32xf32>
    %68 = arith.select %65, %63, %67 : vector<256x32xi1>, vector<256x32xf32>
    %c256_i32 = arith.constant 256 : i32
    %69 = arith.muli %c0_i32, %c256_i32 : i32
    %70 = tpu.assume_multiple %69, 8 : i32
    %c0_50 = arith.constant 0 : index
    %71 = arith.index_cast %70 : i32 to index
    %c0_51 = arith.constant 0 : index
    %72 = vector.load %arg5[%c0_50, %71, %c0_51] : memref<1x256x32xf32, #tpu.memory_space<vmem>>, vector<1x256x32xf32>
    %73 = vector.shape_cast %72 : vector<1x256x32xf32> to vector<256x32xf32>
    %74 = vector.shape_cast %68 : vector<256x32xf32> to vector<1x256x32xf32>
    tpu.vector_store %arg5[%c0_50, %71, %c0_51], %74 {strides = array<i32>} : memref<1x256x32xf32, #tpu.memory_space<vmem>>, vector<1x256x32xf32>,
    %c1_i32_52 = arith.constant 1 : i32
    return
  }
  func.func @transform_0(%arg0: i32, %arg1: i32) -> (i32, i32, i32, i32) {
    %c0_i32 = arith.constant 0 : i32
    %c0_i32_0 = arith.constant 0 : i32
    %c0_i32_1 = arith.constant 0 : i32
    %c0_i32_2 = arith.constant 0 : i32
    return %arg0, %c0_i32, %c0_i32_0, %c0_i32_1 : i32, i32, i32, i32
  }
  func.func @transform_1(%arg0: i32, %arg1: i32) -> (i32, i32) {
    %c0_i32 = arith.constant 0 : i32
    %c0_i32_0 = arith.constant 0 : i32
    %c0_i32_1 = arith.constant 0 : i32
    return %c0_i32, %c0_i32_0 : i32, i32
  }
  func.func @transform_2(%arg0: i32, %arg1: i32) -> (i32, i32) {
    %c0_i32 = arith.constant 0 : i32
    %c0_i32_0 = arith.constant 0 : i32
    %c0_i32_1 = arith.constant 0 : i32
    return %c0_i32, %c0_i32_0 : i32, i32
  }
  func.func @transform_3(%arg0: i32, %arg1: i32) -> (i32, i32, i32) {
    %c0_i32 = arith.constant 0 : i32
    %c0_i32_0 = arith.constant 0 : i32
    return %arg0, %arg1, %c0_i32 : i32, i32, i32
  }
}

</mosaic_0001>

<bundles_post_ra>
// kernel: tile.9
= control target key start
LH: loop header
LB: loop body
LE: loop exit
PB: predicated region body
PF: predicated region fallthrough
CT: control target
= control target key end

     0   :  { %s62_s8 = smov 96   ;;  %vm3_vm0 = vcmask 261120   ;;  %s64_s15 = smov 64   ;;  %vm9_vm1 = vcmask 1048320   ;;  %vm15_vm2 = vcmask 785920   ;;  %vm21_vm3 = vcmask 523520   ;;  %s99_s0 = inlined_call_operand.vmem [shape: f32[16,32], index: 0, kind: input, shape index: {}]   ;;  %s100_s1 = inlined_call_operand.vmem [shape: f32[1,512], index: 1, kind: output, shape index: {}]  }
   0x1   :  { %v53_v0 = vld [vmem:[%s99_s0 + $0x3] ss:$4 sm:$0xf]   ;;  %v54_v1 = vld [vmem:[%s99_s0 + $0x2] ss:$4 sm:$0xf]  }
   0x2   :  { %7 = vrot.lane.b32.xlu0 %v53_v0, %s62_s8  ;;  %v55_v2 = vld [vmem:[%s99_s0 + $0x1] ss:$4 sm:$0xf]   ;;  %v2_v3 = vld [vmem:[%s99_s0] ss:$4 sm:$0xf]  }
   0x3   :  { %s63_s0 = smov 32   ;;  %4 = vst.msk [vmem:[#allocation0] ss:$8 sm:$0xf] %vm3_vm0, %v2_v3  }
   0x4   :  { %19 = vrot.lane.b32.xlu1 %v55_v2, %s63_s0 }
   0x6   :  { %13 = vrot.lane.b32.xlu0 %v54_v1, %s64_s15 }
  0x74   :  { %v8_v4 = vpop.permute.xlu0 %7  }
  0x75   :  { %10 = vst.msk [vmem:[#allocation0] ss:$8 sm:$0xf] %vm9_vm1, %v8_v4  }
  0x76   :  { %v20_v5 = vpop.permute.xlu1 %19  }
  0x78   :  { %v14_v6 = vpop.permute.xlu0 %13  }
  0x79   :  { %16 = vst.msk [vmem:[#allocation0] ss:$8 sm:$0xf] %vm15_vm2, %v14_v6  }
  0x7a   :  { %22 = vst.msk [vmem:[#allocation0] ss:$8 sm:$0xf] %vm21_vm3, %v20_v5  }
  0x81   :  { %v27_v7 = vld [vmem:[#allocation0] sm:$0x1]  ;;  %v32_v8 = vld [vmem:[#allocation0 + $0x8] sm:$0x1]  ;;  %v38_v9 = vld [vmem:[#allocation0 + $0x10] sm:$0x1] }
  0x82   :  { %30 = vst [vmem:[%s100_s1] sm:$0x1] %v27_v7  ;;  %56 = vst [vmem:[%s100_s1 + $0x1] sm:$0x1] %v32_v8  ;;  %v45_v10 = vld [vmem:[#allocation0 + $0x18] sm:$0x1] }
  0x83   :  { %57 = vst [vmem:[%s100_s1 + $0x2] sm:$0x1] %v38_v9  ;;  %58 = vst [vmem:[%s100_s1 + $0x3] sm:$0x1] %v45_v10 }

// kernel: tile.8
= control target key start
LH: loop header
LB: loop body
LE: loop exit
PB: predicated region body
PF: predicated region fallthrough
CT: control target
= control target key end

     0   :  { %s28_s0 = inlined_call_operand.vmem [shape: f32[32], index: 0, kind: input, shape index: {}]   ;;  %s29_s1 = inlined_call_operand.vmem [shape: f32[16,32], index: 1, kind: output, shape index: {}]  }
   0x1   :  { %v4_v0 = vld [vmem:[%s28_s0] ss:$0 sm:$0xff] }
   0x2   :  { %5 = vst [vmem:[%s29_s1] sm:$0xff] %v4_v0  ;;  %8 = vst [vmem:[%s29_s1 + $0x8] sm:$0xff] %v4_v0 }

// kernel: _input_proj_safe.1
= control target key start
LH: loop header
LB: loop body
LE: loop exit
PB: predicated region body
PF: predicated region fallthrough
CT: control target
= control target key end

     0   :  { %s2829_s12 = smov 0   ;;  %s2831_s13 = smov 0   ;;  %s4000_s0 = inlined_call_operand.vmem [shape: f32[2,18,18,4], index: 0, kind: input, shape index: {}]   ;;  %s4001_s1 = inlined_call_operand.vmem [shape: f32[36,32], index: 1, kind: input, shape index: {}]   ;;  %s4002_s2 = inlined_call_operand.vmem [shape: f32[1,32], index: 2, kind: input, shape index: {}]   ;;  %s4003_s3 = inlined_call_operand.vmem [shape: f32[2,256,32], index: 3, kind: output, shape index: {}]  }
   0x1   :  { %s2833_s14 = smov 0  }
   0x2 LB: > { %s25_s15 = sadd.s32 1, %s2795_s13  ;;  %p2406_p0 = scmp.ge.s32.totalorder %s2799_s14, 1  ;;  %s2799_s14 = sphi %s2833_s14, %s13_s14   ;;  %s2795_s13 = sphi %s2831_s13, %s4032_s13   ;;  %s2791_s12 = sphi %s2829_s12, %s4031_s12  }
   0x3   : > { %p27_p1 = scmp.ge.s32.totalorder %s25_s15, 2  ;;  %p151_p2 = scmp.lt.s32.totalorder %s2799_s14, 3 }
   0x5   : > { %s4034_s15 = smov (%p27_p1, %s25_s15), 0  ;;  %p152_p3 = pnand %p2406_p0, %p151_p2 }
   0x7   : > { %155 = sbr.rel (%p152_p3) target bundleno = 852 (0x354), region = 32 }
   0xc   : > { %p179_p4 = scmp.lt.s32.totalorder %s2791_s12, 1  ;;  %s2801_s20 = smov 4   ;;  %vm229_vm0 = vcmask 31744   ;;  %vm422_vm1 = vcmask 64544   ;;  %vm615_vm2 = vcmask 97344   ;;  %vm1953_vm3 = vcmask 1043456  }
   0xd   : > { %s2802_s21 = smov 8   ;;  %s2803_s22 = smov 12   ;;  %vm811_vm4 = vcmask 130144   ;;  %vm1004_vm5 = vcmask 162944   ;;  %vm1197_vm6 = vcmask 195744   ;;  %vm1393_vm7 = vcmask 228544  }
   0xe   : > { %s4036_s12 = smov (!%p179_p4, %s2791_s12), 1  ;;  %s2804_s23 = smov 16   ;;  %vm1586_vm8 = vcmask 261344   ;;  %vm1779_vm9 = vcmask 294144   ;;  %vm1856_vm10 = vcmask 293888   ;;  %vm2278_vm12 = vcmask 261120  }
   0xf   : > { %s2744_s16 = smul.u32 432, %s4036_s12  ;;  %s2805_s24 = smov 20  }
  0x10   : > { %s2806_s25 = smov 24   ;;  %s2807_s26 = smov 28  }
  0x11   : > { %s2853_s19 = scalar_lea.vmem %s4000_s0, %s2744_s16  ;;  %s2808_s8 = smov 32  }
  0x12   : > { %v2856_v0 = vld [vmem:[%s2853_s19 + $0x19] sm:$0xff]  ;;  %v262_v1 = vld [vmem:[%s2853_s19 + $0x1] sm:$0xff]  ;;  %v263_v3 = vld [vmem:[%s2853_s19 + $0x9] sm:$0xff]  ;;  %s2638_s17 = sshll.u32 %s4036_s12, 8 }
  0x13   : > { %330 = vrot.lane.b32.xlu1 %v2856_v0, %s2801_s20  ;;  %326 = vrot.lane.b32.xlu0 %v262_v1, %s2801_s20  ;;  %v2863_v2 = vld [vmem:[%s2853_s19 + $0x21] sm:$0xff]  ;;  %v2870_v4 = vld [vmem:[%s2853_s19 + $0x39] sm:$0xff] }
  0x14   : > { %v2873_v5 = vld [vmem:[%s2853_s19 + $0x31] sm:$0xff]  ;;  %v2883_v7 = vld [vmem:[%s2853_s19 + $0x49] sm:$0xff]  ;;  %v2893_v9 = vld [vmem:[%s2853_s19 + $0x61] sm:$0xff] }
  0x15   : > { %v2880_v6 = vld [vmem:[%s2853_s19 + $0x51] sm:$0xff]  ;;  %v2890_v8 = vld [vmem:[%s2853_s19 + $0x69] sm:$0xff]  ;;  %v2900_v10 = vld [vmem:[%s2853_s19 + $0x81] sm:$0xff] }
  0x16   : > { %v2903_v11 = vld [vmem:[%s2853_s19 + $0x79] sm:$0xff]  ;;  %v2915_v15 = vld [vmem:[%s2853_s19 + $0x91] sm:$0xff]  ;;  %v198_v17 = vld [vmem:[%s2853_s19 + $0x8] sm:$0xff] }
  0x17   : > { %332 = vrot.lane.b32.xlu1 %v2863_v2, %s2801_s20  ;;  %328 = vrot.lane.b32.xlu0 %v263_v3, %s2801_s20  ;;  %v2910_v12 = vld [vmem:[%s2853_s19 + $0x18] sm:$0xff]  ;;  %v197_v13 = vld [vmem:[%s2853_s19] sm:$0xff]  ;;  %231 = vst.msk [vmem:[#allocation2 + $0x8] sm:$0xff] %vm229_vm0, %v198_v17 }
  0x18   : > { %v275_v14 = vld [vmem:[%s2853_s19 + $0x99] sm:$0xff]  ;;  %232 = vst.msk [vmem:[#allocation2 + $0x10] sm:$0xff] %vm229_vm0, %v2910_v12  ;;  %230 = vst.msk [vmem:[#allocation2] sm:$0xff] %vm229_vm0, %v197_v13  ;;  %v277_v18 = vld [vmem:[%s2853_s19 + $0xb1] sm:$0xff] }
  0x19   : > { %v2921_v16 = vld [vmem:[%s2853_s19 + $0x20] sm:$0xff]  ;;  %v2929_v19 = vld [vmem:[%s2853_s19 + $0x38] sm:$0xff]  ;;  %v2932_v20 = vld [vmem:[%s2853_s19 + $0x30] sm:$0xff] }
  0x1a   : > { %233 = vst.msk [vmem:[#allocation2 + $0x18] sm:$0xff] %vm229_vm0, %v2921_v16  ;;  %v276_v21 = vld [vmem:[%s2853_s19 + $0xa9] sm:$0xff]  ;;  %235 = vst.msk [vmem:[#allocation2 + $0x28] sm:$0xff] %vm229_vm0, %v2929_v19  ;;  %v2954_v25 = vld [vmem:[%s2853_s19 + $0x60] sm:$0xff] }
  0x1b   : > { %336 = vrot.lane.b32.xlu1 %v2870_v4, %s2801_s20  ;;  %334 = vrot.lane.b32.xlu0 %v2873_v5, %s2801_s20  ;;  %234 = vst.msk [vmem:[#allocation2 + $0x20] sm:$0xff] %vm229_vm0, %v2932_v20  ;;  %v2943_v22 = vld [vmem:[%s2853_s19 + $0x50] sm:$0xff]  ;;  %v2948_v23 = vld [vmem:[%s2853_s19 + $0x48] sm:$0xff]  ;;  %238 = vst.msk [vmem:[#allocation2 + $0x40] sm:$0xff] %vm229_vm0, %v2954_v25 }
  0x1c   : > { %237 = vst.msk [vmem:[#allocation2 + $0x38] sm:$0xff] %vm229_vm0, %v2943_v22  ;;  %v2951_v24 = vld [vmem:[%s2853_s19 + $0x68] sm:$0xff]  ;;  %236 = vst.msk [vmem:[#allocation2 + $0x30] sm:$0xff] %vm229_vm0, %v2948_v23  ;;  %v2963_v26 = vld [vmem:[%s2853_s19 + $0x80] sm:$0xff] }
  0x1d   : > { %239 = vst.msk [vmem:[#allocation2 + $0x48] sm:$0xff] %vm229_vm0, %v2951_v24  ;;  %v2966_v27 = vld [vmem:[%s2853_s19 + $0x78] sm:$0xff]  ;;  %v279_v29 = vld [vmem:[%s2853_s19 + $0xc9] sm:$0xff]  ;;  %v278_v30 = vld [vmem:[%s2853_s19 + $0xc1] sm:$0xff] }
  0x1e   : > { %v2969_v28 = vld [vmem:[%s2853_s19 + $0x98] sm:$0xff]  ;;  %241 = vst.msk [vmem:[#allocation2 + $0x58] sm:$0xff] %vm229_vm0, %v2963_v26  ;;  %240 = vst.msk [vmem:[#allocation2 + $0x50] sm:$0xff] %vm229_vm0, %v2966_v27  ;;  %v2980_v31 = vld [vmem:[%s2853_s19 + $0x90] sm:$0xff] }
  0x1f   : > { %340 = vrot.lane.b32.xlu1 %v2880_v6, %s2801_s20  ;;  %338 = vrot.lane.b32.xlu0 %v2883_v7, %s2801_s20  ;;  %243 = vst.msk [vmem:[#allocation2 + $0x68] sm:$0xff] %vm229_vm0, %v2969_v28  ;;  %v2983_v32 = vld [vmem:[%s2853_s19 + $0xb0] sm:$0xff]  ;;  %v2986_v33 = vld [vmem:[%s2853_s19 + $0xa8] sm:$0xff]  ;;  %242 = vst.msk [vmem:[#allocation2 + $0x60] sm:$0xff] %vm229_vm0, %v2980_v31 }
  0x20   : > { %245 = vst.msk [vmem:[#allocation2 + $0x78] sm:$0xff] %vm229_vm0, %v2983_v32  ;;  %244 = vst.msk [vmem:[#allocation2 + $0x70] sm:$0xff] %vm229_vm0, %v2986_v33  ;;  %v2997_v34 = vld [vmem:[%s2853_s19 + $0xc8] sm:$0xff]  ;;  %v3000_v35 = vld [vmem:[%s2853_s19 + $0xc0] sm:$0xff] }
  0x21   : > { %247 = vst.msk [vmem:[#allocation2 + $0x88] sm:$0xff] %vm229_vm0, %v2997_v34  ;;  %246 = vst.msk [vmem:[#allocation2 + $0x80] sm:$0xff] %vm229_vm0, %v3000_v35  ;;  %v3007_v36 = vld [vmem:[%s2853_s19 + $0xe0] sm:$0xff]  ;;  %v3010_v37 = vld [vmem:[%s2853_s19 + $0xd8] sm:$0xff] }
  0x22   : > { %v3013_v38 = vld [vmem:[%s2853_s19 + $0xf8] sm:$0xff]  ;;  %249 = vst.msk [vmem:[#allocation2 + $0x98] sm:$0xff] %vm229_vm0, %v3007_v36  ;;  %248 = vst.msk [vmem:[#allocation2 + $0x90] sm:$0xff] %vm229_vm0, %v3010_v37  ;;  %v3022_v39 = vld [vmem:[%s2853_s19 + $0xf0] sm:$0xff] }
  0x23   : > { %344 = vrot.lane.b32.xlu1 %v2890_v8, %s2801_s20  ;;  %342 = vrot.lane.b32.xlu0 %v2893_v9, %s2801_s20  ;;  %251 = vst.msk [vmem:[#allocation2 + $0xa8] sm:$0xff] %vm229_vm0, %v3013_v38  ;;  %v3025_v40 = vld [vmem:[%s2853_s19 + $0x110] sm:$0xff]  ;;  %v3028_v41 = vld [vmem:[%s2853_s19 + $0x108] sm:$0xff]  ;;  %250 = vst.msk [vmem:[#allocation2 + $0xa0] sm:$0xff] %vm229_vm0, %v3022_v39 }
  0x24   : > { %253 = vst.msk [vmem:[#allocation2 + $0xb8] sm:$0xff] %vm229_vm0, %v3025_v40  ;;  %252 = vst.msk [vmem:[#allocation2 + $0xb0] sm:$0xff] %vm229_vm0, %v3028_v41  ;;  %v3039_v42 = vld [vmem:[%s2853_s19 + $0xe1] sm:$0xff]  ;;  %v3042_v43 = vld [vmem:[%s2853_s19 + $0xd9] sm:$0xff] }
  0x25   : > { %v3045_v44 = vld [vmem:[%s2853_s19 + $0x128] sm:$0xff]  ;;  %v3048_v45 = vld [vmem:[%s2853_s19 + $0x120] sm:$0xff]  ;;  %v3062_v47 = vld [vmem:[%s2853_s19 + $0xf1] sm:$0xff] }
  0x26   : > { %255 = vst.msk [vmem:[#allocation2 + $0xc8] sm:$0xff] %vm229_vm0, %v3045_v44  ;;  %254 = vst.msk [vmem:[#allocation2 + $0xc0] sm:$0xff] %vm229_vm0, %v3048_v45  ;;  %v3059_v46 = vld [vmem:[%s2853_s19 + $0xf9] sm:$0xff]  ;;  %v3079_v50 = vld [vmem:[%s2853_s19 + $0x111] sm:$0xff] }
  0x27   : > { %348 = vrot.lane.b32.xlu1 %v2900_v10, %s2801_s20  ;;  %346 = vrot.lane.b32.xlu0 %v2903_v11, %s2801_s20  ;;  %v3065_v48 = vld [vmem:[%s2853_s19 + $0x140] sm:$0xff]  ;;  %v3068_v49 = vld [vmem:[%s2853_s19 + $0x138] sm:$0xff]  ;;  %4017 = vst [vmem:[#allocation3_spill] sm:$0xff] %v3079_v50 }
  0x28   : > { %257 = vst.msk [vmem:[#allocation2 + $0xd8] sm:$0xff] %vm229_vm0, %v3065_v48  ;;  %256 = vst.msk [vmem:[#allocation2 + $0xd0] sm:$0xff] %vm229_vm0, %v3068_v49  ;;  %v3082_v51 = vld [vmem:[%s2853_s19 + $0x109] sm:$0xff]  ;;  %v3085_v52 = vld [vmem:[%s2853_s19 + $0x158] sm:$0xff] }
  0x29   : > { %v3088_v53 = vld [vmem:[%s2853_s19 + $0x150] sm:$0xff]  ;;  %259 = vst.msk [vmem:[#allocation2 + $0xe8] sm:$0xff] %vm229_vm0, %v3085_v52  ;;  %v286_v55 = vld [vmem:[%s2853_s19 + $0x121] sm:$0xff]  ;;  %v288_v59 = vld [vmem:[%s2853_s19 + $0x139] sm:$0xff] }
  0x2a   : > { %258 = vst.msk [vmem:[#allocation2 + $0xe0] sm:$0xff] %vm229_vm0, %v3088_v53  ;;  %v287_v54 = vld [vmem:[%s2853_s19 + $0x129] sm:$0xff]  ;;  %v289_v58 = vld [vmem:[%s2853_s19 + $0x141] sm:$0xff]  ;;  %v291_v60 = vld [vmem:[%s2853_s19 + $0x159] sm:$0xff] }
  0x2b   : > { %352 = vrot.lane.b32.xlu1 %v275_v14, %s2801_s20  ;;  %350 = vrot.lane.b32.xlu0 %v2915_v15, %s2801_s20  ;;  %v3101_v56 = vld [vmem:[%s2853_s19 + $0x170] sm:$0xff]  ;;  %v3104_v57 = vld [vmem:[%s2853_s19 + $0x168] sm:$0xff] }
  0x2c   : > { %261 = vst.msk [vmem:[#allocation2 + $0xf8] sm:$0xff] %vm229_vm0, %v3101_v56  ;;  %260 = vst.msk [vmem:[#allocation2 + $0xf0] sm:$0xff] %vm229_vm0, %v3104_v57  ;;  %v290_v61 = vld [vmem:[%s2853_s19 + $0x151] sm:$0xff]  ;;  %v292_v63 = vld [vmem:[%s2853_s19 + $0x169] sm:$0xff] }
  0x2d   : > { %v293_v62 = vld [vmem:[%s2853_s19 + $0x171] sm:$0xff]  ;;  %v455_v3 = vld [vmem:[%s2853_s19 + $0x2] sm:$0xff]  ;;  %v3132_v14 = vld [vmem:[%s2853_s19 + $0x1a] sm:$0xff] }
  0x2e   : > { %v456_v1 = vld [vmem:[%s2853_s19 + $0xa] sm:$0xff]  ;;  %v3129_v13 = vld [vmem:[%s2853_s19 + $0x22] sm:$0xff]  ;;  %v3139_v17 = vld [vmem:[%s2853_s19 + $0x3a] sm:$0xff] }
  0x2f   : > { %356 = vrot.lane.b32.xlu1 %v277_v18, %s2801_s20  ;;  %354 = vrot.lane.b32.xlu0 %v276_v21, %s2801_s20  ;;  %v3142_v18 = vld [vmem:[%s2853_s19 + $0x32] sm:$0xff] }
  0x30   : > { %v3149_v21 = vld [vmem:[%s2853_s19 + $0x52] sm:$0xff] }
  0x31   : > { %4018 = vst [vmem:[#allocation4_spill] sm:$0xff] %v3149_v21 }
  0x33   : > { %360 = vrot.lane.b32.xlu1 %v279_v29, %s2801_s20  ;;  %358 = vrot.lane.b32.xlu0 %v278_v30, %s2801_s20  ;;  %v3152_v29 = vld [vmem:[%s2853_s19 + $0x4a] sm:$0xff] }
  0x34   : > { %4019 = vst [vmem:[#allocation5_spill] sm:$0xff] %v3152_v29  ;;  %v464_v30 = vld [vmem:[%s2853_s19 + $0x6a] sm:$0xff] }
  0x37   : > { %364 = vrot.lane.b32.xlu1 %v3039_v42, %s2801_s20  ;;  %362 = vrot.lane.b32.xlu0 %v3042_v43, %s2801_s20 }
  0x3b   : > { %368 = vrot.lane.b32.xlu1 %v3059_v46, %s2801_s20  ;;  %366 = vrot.lane.b32.xlu0 %v3062_v47, %s2801_s20 }
  0x3f   : > { %372 = vrot.lane.b32.xlu1 %v3079_v50, %s2801_s20  ;;  %370 = vrot.lane.b32.xlu0 %v3082_v51, %s2801_s20 }
  0x43   : > { %376 = vrot.lane.b32.xlu1 %v287_v54, %s2801_s20  ;;  %374 = vrot.lane.b32.xlu0 %v286_v55, %s2801_s20  ;;  %v463_v54 = vld [vmem:[%s2853_s19 + $0x62] sm:$0xff] }
  0x44   : > { %v466_v55 = vld [vmem:[%s2853_s19 + $0x82] sm:$0xff] }
  0x47   : > { %380 = vrot.lane.b32.xlu1 %v289_v58, %s2801_s20  ;;  %378 = vrot.lane.b32.xlu0 %v288_v59, %s2801_s20  ;;  %v465_v58 = vld [vmem:[%s2853_s19 + $0x7a] sm:$0xff] }
  0x48   : > { %v468_v59 = vld [vmem:[%s2853_s19 + $0x9a] sm:$0xff] }
  0x4b   : > { %384 = vrot.lane.b32.xlu1 %v291_v60, %s2801_s20  ;;  %382 = vrot.lane.b32.xlu0 %v290_v61, %s2801_s20  ;;  %v467_v60 = vld [vmem:[%s2853_s19 + $0x92] sm:$0xff] }
  0x4c   : > { %v470_v61 = vld [vmem:[%s2853_s19 + $0xb2] sm:$0xff] }
  0x4f   : > { %388 = vrot.lane.b32.xlu1 %v293_v62, %s2801_s20  ;;  %386 = vrot.lane.b32.xlu0 %v292_v63, %s2801_s20  ;;  %v469_v62 = vld [vmem:[%s2853_s19 + $0xaa] sm:$0xff]  ;;  %s3858_s20 = scalar_lea.vmem %s4003_s3, %s2638_s17 }
  0x50   : > { %v472_v63 = vld [vmem:[%s2853_s19 + $0xca] sm:$0xff] }
  0x53   : > { %521 = vrot.lane.b32.xlu1 %v456_v1, %s2802_s21  ;;  %519 = vrot.lane.b32.xlu0 %v455_v3, %s2802_s21  ;;  %v471_v1 = vld [vmem:[%s2853_s19 + $0xc2] sm:$0xff] }
  0x54   : > { %v3179_v3 = vld [vmem:[%s2853_s19 + $0xe2] sm:$0xff] }
  0x57   : > { %525 = vrot.lane.b32.xlu1 %v3129_v13, %s2802_s21  ;;  %523 = vrot.lane.b32.xlu0 %v3132_v14, %s2802_s21 }
  0x5b   : > { %529 = vrot.lane.b32.xlu1 %v3139_v17, %s2802_s21  ;;  %527 = vrot.lane.b32.xlu0 %v3142_v18, %s2802_s21 }
  0x5f   : > { %533 = vrot.lane.b32.xlu1 %v3149_v21, %s2802_s21  ;;  %531 = vrot.lane.b32.xlu0 %v3152_v29, %s2802_s21  ;;  %v484_v21 = vld [vmem:[%s2853_s19 + $0x15a] sm:$0xff] }
  0x63   : > { %537 = vrot.lane.b32.xlu1 %v464_v30, %s2802_s21  ;;  %535 = vrot.lane.b32.xlu0 %v463_v54, %s2802_s21  ;;  %v3182_v30 = vld [vmem:[%s2853_s19 + $0xda] sm:$0xff] }
  0x64   : > { %v3189_v54 = vld [vmem:[%s2853_s19 + $0xfa] sm:$0xff] }
  0x67   : > { %541 = vrot.lane.b32.xlu1 %v466_v55, %s2802_s21  ;;  %539 = vrot.lane.b32.xlu0 %v465_v58, %s2802_s21  ;;  %v3192_v55 = vld [vmem:[%s2853_s19 + $0xf2] sm:$0xff] }
  0x68   : > { %v3199_v58 = vld [vmem:[%s2853_s19 + $0x112] sm:$0xff] }
  0x69   : > { %4020 = vst [vmem:[#allocation6_spill] sm:$0xff] %v3199_v58 }
  0x6b   : > { %545 = vrot.lane.b32.xlu1 %v468_v59, %s2802_s21  ;;  %543 = vrot.lane.b32.xlu0 %v467_v60, %s2802_s21  ;;  %v3202_v59 = vld [vmem:[%s2853_s19 + $0x10a] sm:$0xff] }
  0x6c   : > { %4021 = vst [vmem:[#allocation7_spill] sm:$0xff] %v3202_v59  ;;  %v3209_v60 = vld [vmem:[%s2853_s19 + $0x12a] sm:$0xff] }
  0x6d   : > { %4022 = vst [vmem:[#allocation8_spill] sm:$0xff] %v3209_v60 }
  0x6f   : > { %549 = vrot.lane.b32.xlu1 %v470_v61, %s2802_s21  ;;  %547 = vrot.lane.b32.xlu0 %v469_v62, %s2802_s21  ;;  %v3212_v61 = vld [vmem:[%s2853_s19 + $0x122] sm:$0xff] }
  0x70   : > { %4023 = vst [vmem:[#allocation9_spill] sm:$0xff] %v3212_v61  ;;  %v482_v62 = vld [vmem:[%s2853_s19 + $0x142] sm:$0xff] }
  0x73   : > { %553 = vrot.lane.b32.xlu1 %v472_v63, %s2802_s21  ;;  %551 = vrot.lane.b32.xlu0 %v471_v1, %s2802_s21  ;;  %v481_v63 = vld [vmem:[%s2853_s19 + $0x13a] sm:$0xff] }
  0x77   : > { %557 = vrot.lane.b32.xlu1 %v3179_v3, %s2802_s21  ;;  %555 = vrot.lane.b32.xlu0 %v3182_v30, %s2802_s21 }
  0x7b   : > { %561 = vrot.lane.b32.xlu1 %v3189_v54, %s2802_s21  ;;  %559 = vrot.lane.b32.xlu0 %v3192_v55, %s2802_s21 }
  0x7f   : > { %565 = vrot.lane.b32.xlu1 %v3199_v58, %s2802_s21  ;;  %563 = vrot.lane.b32.xlu0 %v3202_v59, %s2802_s21 }
  0x83   : > { %569 = vrot.lane.b32.xlu1 %v3209_v60, %s2802_s21  ;;  %567 = vrot.lane.b32.xlu0 %v3212_v61, %s2802_s21  ;;  %v483_v60 = vld [vmem:[%s2853_s19 + $0x152] sm:$0xff] }
  0x84   : > { %v486_v61 = vld [vmem:[%s2853_s19 + $0x172] sm:$0xff] }
  0x85   : > { %v331_v1 = vpop.permute.xlu1 %330  ;;  %v327_v58 = vpop.permute.xlu0 %326 }
  0x86   : > { %425 = vst.msk [vmem:[#allocation2 + $0x10] sm:$0xff] %vm422_vm1, %v331_v1  ;;  %423 = vst.msk [vmem:[#allocation2] sm:$0xff] %vm422_vm1, %v327_v58  ;;  %v485_v1 = vld [vmem:[%s2853_s19 + $0x16a] sm:$0xff] }
  0x87   : > { %573 = vrot.lane.b32.xlu1 %v482_v62, %s2802_s21  ;;  %571 = vrot.lane.b32.xlu0 %v481_v63, %s2802_s21 }
  0x89   : > { %v333_v29 = vpop.permute.xlu1 %332  ;;  %v329_v59 = vpop.permute.xlu0 %328 }
  0x8a   : > { %426 = vst.msk [vmem:[#allocation2 + $0x18] sm:$0xff] %vm422_vm1, %v333_v29  ;;  %424 = vst.msk [vmem:[#allocation2 + $0x8] sm:$0xff] %vm422_vm1, %v329_v59 }
  0x8b   : > { %577 = vrot.lane.b32.xlu1 %v484_v21, %s2802_s21  ;;  %575 = vrot.lane.b32.xlu0 %v483_v60, %s2802_s21 }
  0x8d   : > { %v337_v50 = vpop.permute.xlu1 %336  ;;  %v335_v58 = vpop.permute.xlu0 %334 }
  0x8e   : > { %428 = vst.msk [vmem:[#allocation2 + $0x28] sm:$0xff] %vm422_vm1, %v337_v50  ;;  %427 = vst.msk [vmem:[#allocation2 + $0x20] sm:$0xff] %vm422_vm1, %v335_v58 }
  0x8f   : > { %581 = vrot.lane.b32.xlu1 %v486_v61, %s2802_s21  ;;  %579 = vrot.lane.b32.xlu0 %v485_v1, %s2802_s21 }
  0x91   : > { %v341_v62 = vpop.permute.xlu1 %340  ;;  %v339_v29 = vpop.permute.xlu0 %338 }
  0x92   : > { %430 = vst.msk [vmem:[#allocation2 + $0x38] sm:$0xff] %vm422_vm1, %v341_v62  ;;  %429 = vst.msk [vmem:[#allocation2 + $0x30] sm:$0xff] %vm422_vm1, %v339_v29 }
  0x93   : > { %717 = vrot.lane.b32.xlu1 %v2921_v16, %s2803_s22  ;;  %715 = vrot.lane.b32.xlu0 %v2910_v12, %s2803_s22 }
  0x95   : > { %v345_v50 = vpop.permute.xlu1 %344  ;;  %v343_v21 = vpop.permute.xlu0 %342 }
  0x96   : > { %432 = vst.msk [vmem:[#allocation2 + $0x48] sm:$0xff] %vm422_vm1, %v345_v50  ;;  %431 = vst.msk [vmem:[#allocation2 + $0x40] sm:$0xff] %vm422_vm1, %v343_v21 }
  0x97   : > { %721 = vrot.lane.b32.xlu1 %v2929_v19, %s2803_s22  ;;  %719 = vrot.lane.b32.xlu0 %v2932_v20, %s2803_s22 }
  0x99   : > { %v349_v59 = vpop.permute.xlu1 %348  ;;  %v347_v60 = vpop.permute.xlu0 %346 }
  0x9a   : > { %434 = vst.msk [vmem:[#allocation2 + $0x58] sm:$0xff] %vm422_vm1, %v349_v59  ;;  %433 = vst.msk [vmem:[#allocation2 + $0x50] sm:$0xff] %vm422_vm1, %v347_v60 }
  0x9b   : > { %725 = vrot.lane.b32.xlu1 %v2943_v22, %s2803_s22  ;;  %723 = vrot.lane.b32.xlu0 %v2948_v23, %s2803_s22 }
  0x9d   : > { %v353_v12 = vpop.permute.xlu1 %352  ;;  %v351_v16 = vpop.permute.xlu0 %350 }
  0x9e   : > { %436 = vst.msk [vmem:[#allocation2 + $0x68] sm:$0xff] %vm422_vm1, %v353_v12  ;;  %435 = vst.msk [vmem:[#allocation2 + $0x60] sm:$0xff] %vm422_vm1, %v351_v16 }
  0x9f   : > { %729 = vrot.lane.b32.xlu1 %v2951_v24, %s2803_s22  ;;  %727 = vrot.lane.b32.xlu0 %v2954_v25, %s2803_s22 }
  0xa1   : > { %v357_v61 = vpop.permute.xlu1 %356  ;;  %v355_v63 = vpop.permute.xlu0 %354 }
  0xa2   : > { %438 = vst.msk [vmem:[#allocation2 + $0x78] sm:$0xff] %vm422_vm1, %v357_v61  ;;  %437 = vst.msk [vmem:[#allocation2 + $0x70] sm:$0xff] %vm422_vm1, %v355_v63 }
  0xa3   : > { %733 = vrot.lane.b32.xlu1 %v2963_v26, %s2803_s22  ;;  %731 = vrot.lane.b32.xlu0 %v2966_v27, %s2803_s22 }
  0xa5   : > { %v361_v1 = vpop.permute.xlu1 %360  ;;  %v359_v58 = vpop.permute.xlu0 %358 }
  0xa6   : > { %440 = vst.msk [vmem:[#allocation2 + $0x88] sm:$0xff] %vm422_vm1, %v361_v1  ;;  %439 = vst.msk [vmem:[#allocation2 + $0x80] sm:$0xff] %vm422_vm1, %v359_v58  ;;  %v2441_v1 = vld [vmem:[%s2853_s19 + $0x188] sm:$0xff]  ;;  %v2440_v58 = vld [vmem:[%s2853_s19 + $0x180] sm:$0xff] }
  0xa7   : > { %737 = vrot.lane.b32.xlu1 %v2969_v28, %s2803_s22  ;;  %735 = vrot.lane.b32.xlu0 %v2980_v31, %s2803_s22 }
  0xa9   : > { %v365_v62 = vpop.permute.xlu1 %364  ;;  %v363_v29 = vpop.permute.xlu0 %362 }
  0xaa   : > { %442 = vst.msk [vmem:[#allocation2 + $0x98] sm:$0xff] %vm422_vm1, %v365_v62  ;;  %441 = vst.msk [vmem:[#allocation2 + $0x90] sm:$0xff] %vm422_vm1, %v363_v29 }
  0xab   : > { %741 = vrot.lane.b32.xlu1 %v2983_v32, %s2803_s22  ;;  %739 = vrot.lane.b32.xlu0 %v2986_v33, %s2803_s22 }
  0xad   : > { %v369_v50 = vpop.permute.xlu1 %368  ;;  %v367_v21 = vpop.permute.xlu0 %366 }
  0xae   : > { %444 = vst.msk [vmem:[#allocation2 + $0xa8] sm:$0xff] %vm422_vm1, %v369_v50  ;;  %443 = vst.msk [vmem:[#allocation2 + $0xa0] sm:$0xff] %vm422_vm1, %v367_v21 }
  0xaf   : > { %745 = vrot.lane.b32.xlu1 %v2997_v34, %s2803_s22  ;;  %743 = vrot.lane.b32.xlu0 %v3000_v35, %s2803_s22 }
  0xb1   : > { %v373_v28 = vpop.permute.xlu1 %372  ;;  %v371_v31 = vpop.permute.xlu0 %370 }
  0xb2   : > { %446 = vst.msk [vmem:[#allocation2 + $0xb8] sm:$0xff] %vm422_vm1, %v373_v28  ;;  %445 = vst.msk [vmem:[#allocation2 + $0xb0] sm:$0xff] %vm422_vm1, %v371_v31 }
  0xb3   : > { %749 = vrot.lane.b32.xlu1 %v3007_v36, %s2803_s22  ;;  %747 = vrot.lane.b32.xlu0 %v3010_v37, %s2803_s22 }
  0xb5   : > { %v377_v32 = vpop.permute.xlu1 %376  ;;  %v375_v33 = vpop.permute.xlu0 %374 }
  0xb6   : > { %448 = vst.msk [vmem:[#allocation2 + $0xc8] sm:$0xff] %vm422_vm1, %v377_v32  ;;  %447 = vst.msk [vmem:[#allocation2 + $0xc0] sm:$0xff] %vm422_vm1, %v375_v33 }
  0xb7   : > { %753 = vrot.lane.b32.xlu1 %v3013_v38, %s2803_s22  ;;  %751 = vrot.lane.b32.xlu0 %v3022_v39, %s2803_s22 }
  0xb9   : > { %v381_v34 = vpop.permute.xlu1 %380  ;;  %v379_v35 = vpop.permute.xlu0 %378 }
  0xba   : > { %450 = vst.msk [vmem:[#allocation2 + $0xd8] sm:$0xff] %vm422_vm1, %v381_v34  ;;  %449 = vst.msk [vmem:[#allocation2 + $0xd0] sm:$0xff] %vm422_vm1, %v379_v35 }
  0xbb   : > { %757 = vrot.lane.b32.xlu1 %v3025_v40, %s2803_s22  ;;  %755 = vrot.lane.b32.xlu0 %v3028_v41, %s2803_s22 }
  0xbd   : > { %v385_v36 = vpop.permute.xlu1 %384  ;;  %v383_v37 = vpop.permute.xlu0 %382 }
  0xbe   : > { %452 = vst.msk [vmem:[#allocation2 + $0xe8] sm:$0xff] %vm422_vm1, %v385_v36  ;;  %451 = vst.msk [vmem:[#allocation2 + $0xe0] sm:$0xff] %vm422_vm1, %v383_v37 }
  0xbf   : > { %761 = vrot.lane.b32.xlu1 %v3045_v44, %s2803_s22  ;;  %759 = vrot.lane.b32.xlu0 %v3048_v45, %s2803_s22 }
  0xc1   : > { %v389_v59 = vpop.permute.xlu1 %388  ;;  %v387_v60 = vpop.permute.xlu0 %386 }
  0xc2   : > { %454 = vst.msk [vmem:[#allocation2 + $0xf8] sm:$0xff] %vm422_vm1, %v389_v59  ;;  %453 = vst.msk [vmem:[#allocation2 + $0xf0] sm:$0xff] %vm422_vm1, %v387_v60  ;;  %v1845_v59 = vld [vmem:[%s4001_s1 + $0x8] sm:$0xff] }
  0xc3   : > { %765 = vrot.lane.b32.xlu1 %v3065_v48, %s2803_s22  ;;  %763 = vrot.lane.b32.xlu0 %v3068_v49, %s2803_s22 }
  0xc5   : > { %v522_v12 = vpop.permute.xlu1 %521  ;;  %v520_v16 = vpop.permute.xlu0 %519 }
  0xc6   : > { %617 = vst.msk [vmem:[#allocation2 + $0x8] sm:$0xff] %vm615_vm2, %v522_v12  ;;  %616 = vst.msk [vmem:[#allocation2] sm:$0xff] %vm615_vm2, %v520_v16 }
  0xc7   : > { %769 = vrot.lane.b32.xlu1 %v3085_v52, %s2803_s22  ;;  %767 = vrot.lane.b32.xlu0 %v3088_v53, %s2803_s22 }
  0xc9   : > { %v526_v61 = vpop.permute.xlu1 %525  ;;  %v524_v63 = vpop.permute.xlu0 %523 }
  0xca   : > { %619 = vst.msk [vmem:[#allocation2 + $0x18] sm:$0xff] %vm615_vm2, %v526_v61  ;;  %618 = vst.msk [vmem:[#allocation2 + $0x10] sm:$0xff] %vm615_vm2, %v524_v63 }
  0xcb   : > { %773 = vrot.lane.b32.xlu1 %v3101_v56, %s2803_s22  ;;  %771 = vrot.lane.b32.xlu0 %v3104_v57, %s2803_s22 }
  0xcd   : > { %v530_v62 = vpop.permute.xlu1 %529  ;;  %v528_v29 = vpop.permute.xlu0 %527 }
  0xce   : > { %621 = vst.msk [vmem:[#allocation2 + $0x28] sm:$0xff] %vm615_vm2, %v530_v62  ;;  %620 = vst.msk [vmem:[#allocation2 + $0x20] sm:$0xff] %vm615_vm2, %v528_v29 }
  0xcf   : > { %777 = vrot.lane.b32.xlu1 %v2441_v1, %s2803_s22  ;;  %775 = vrot.lane.b32.xlu0 %v2440_v58, %s2803_s22 }
  0xd1   : > { %v534_v50 = vpop.permute.xlu1 %533  ;;  %v532_v21 = vpop.permute.xlu0 %531 }
  0xd2   : > { %623 = vst.msk [vmem:[#allocation2 + $0x38] sm:$0xff] %vm615_vm2, %v534_v50  ;;  %622 = vst.msk [vmem:[#allocation2 + $0x30] sm:$0xff] %vm615_vm2, %v532_v21  ;;  %v4026_v50 = vld [vmem:[#allocation5_spill] sm:$0xff] }
  0xd3   : > { %910 = vrot.lane.b32.xlu1 %v2863_v2, %s2804_s23  ;;  %908 = vrot.lane.b32.xlu0 %v2856_v0, %s2804_s23 }
  0xd5   : > { %v538_v56 = vpop.permute.xlu1 %537  ;;  %v536_v57 = vpop.permute.xlu0 %535 }
  0xd6   : > { %625 = vst.msk [vmem:[#allocation2 + $0x48] sm:$0xff] %vm615_vm2, %v538_v56  ;;  %624 = vst.msk [vmem:[#allocation2 + $0x40] sm:$0xff] %vm615_vm2, %v536_v57 }
  0xd7   : > { %914 = vrot.lane.b32.xlu1 %v2870_v4, %s2804_s23  ;;  %912 = vrot.lane.b32.xlu0 %v2873_v5, %s2804_s23 }
  0xd9   : > { %v542_v28 = vpop.permute.xlu1 %541  ;;  %v540_v31 = vpop.permute.xlu0 %539 }
  0xda   : > { %627 = vst.msk [vmem:[#allocation2 + $0x58] sm:$0xff] %vm615_vm2, %v542_v28  ;;  %626 = vst.msk [vmem:[#allocation2 + $0x50] sm:$0xff] %vm615_vm2, %v540_v31  ;;  %v4027_v28 = vld [vmem:[#allocation4_spill] sm:$0xff] }
  0xdb   : > { %918 = vrot.lane.b32.xlu1 %v2880_v6, %s2804_s23  ;;  %916 = vrot.lane.b32.xlu0 %v2883_v7, %s2804_s23 }
  0xdd   : > { %v546_v0 = vpop.permute.xlu1 %545  ;;  %v544_v2 = vpop.permute.xlu0 %543 }
  0xde   : > { %629 = vst.msk [vmem:[#allocation2 + $0x68] sm:$0xff] %vm615_vm2, %v546_v0  ;;  %628 = vst.msk [vmem:[#allocation2 + $0x60] sm:$0xff] %vm615_vm2, %v544_v2  ;;  %v4028_v2 = vld [vmem:[#allocation6_spill] sm:$0xff] }
  0xdf   : > { %922 = vrot.lane.b32.xlu1 %v2890_v8, %s2804_s23  ;;  %920 = vrot.lane.b32.xlu0 %v2893_v9, %s2804_s23 }
  0xe1   : > { %v550_v32 = vpop.permute.xlu1 %549  ;;  %v548_v33 = vpop.permute.xlu0 %547 }
  0xe2   : > { %631 = vst.msk [vmem:[#allocation2 + $0x78] sm:$0xff] %vm615_vm2, %v550_v32  ;;  %630 = vst.msk [vmem:[#allocation2 + $0x70] sm:$0xff] %vm615_vm2, %v548_v33 }
  0xe3   : > { %926 = vrot.lane.b32.xlu1 %v2900_v10, %s2804_s23  ;;  %924 = vrot.lane.b32.xlu0 %v2903_v11, %s2804_s23 }
  0xe5   : > { %v554_v34 = vpop.permute.xlu1 %553  ;;  %v552_v35 = vpop.permute.xlu0 %551 }
  0xe6   : > { %633 = vst.msk [vmem:[#allocation2 + $0x88] sm:$0xff] %vm615_vm2, %v554_v34  ;;  %632 = vst.msk [vmem:[#allocation2 + $0x80] sm:$0xff] %vm615_vm2, %v552_v35 }
  0xe7   : > { %940 = vrot.lane.b32.xlu1 %v3042_v43, %s2804_s23  ;;  %928 = vrot.lane.b32.xlu0 %v2915_v15, %s2804_s23 }
  0xe9   : > { %v558_v8 = vpop.permute.xlu1 %557  ;;  %v556_v9 = vpop.permute.xlu0 %555 }
  0xea   : > { %635 = vst.msk [vmem:[#allocation2 + $0x98] sm:$0xff] %vm615_vm2, %v558_v8  ;;  %634 = vst.msk [vmem:[#allocation2 + $0x90] sm:$0xff] %vm615_vm2, %v556_v9  ;;  %v2542_v8 = vld [vmem:[%s2853_s19 + $0x61] sm:$0xff] }
  0xeb   : > { %1101 = vrot.lane.b32.xlu1 %v3132_v14, %s2805_s24  ;;  %942 = vrot.lane.b32.xlu0 %v3039_v42, %s2804_s23 }
  0xed   : > { %v562_v10 = vpop.permute.xlu1 %561  ;;  %v560_v11 = vpop.permute.xlu0 %559 }
  0xee   : > { %637 = vst.msk [vmem:[#allocation2 + $0xa8] sm:$0xff] %vm615_vm2, %v562_v10  ;;  %636 = vst.msk [vmem:[#allocation2 + $0xa0] sm:$0xff] %vm615_vm2, %v560_v11 }
  0xef   : > { %1103 = vrot.lane.b32.xlu1 %v3129_v13, %s2805_s24  ;;  %1133 = vrot.lane.b32.xlu0 %v3182_v30, %s2805_s24 }
  0xf1   : > { %v566_v15 = vpop.permute.xlu1 %565  ;;  %v564_v43 = vpop.permute.xlu0 %563 }
  0xf2   : > { %639 = vst.msk [vmem:[#allocation2 + $0xb8] sm:$0xff] %vm615_vm2, %v566_v15  ;;  %638 = vst.msk [vmem:[#allocation2 + $0xb0] sm:$0xff] %vm615_vm2, %v564_v43  ;;  %v2543_v15 = vld [vmem:[%s2853_s19 + $0x69] sm:$0xff] }
  0xf3   : > { %1297 = vrot.lane.b32.xlu1 %v2932_v20, %s2806_s25  ;;  %1135 = vrot.lane.b32.xlu0 %v3179_v3, %s2805_s24 }
  0xf5   : > { %v570_v42 = vpop.permute.xlu1 %569  ;;  %v568_v14 = vpop.permute.xlu0 %567 }
  0xf6   : > { %641 = vst.msk [vmem:[#allocation2 + $0xc8] sm:$0xff] %vm615_vm2, %v570_v42  ;;  %640 = vst.msk [vmem:[#allocation2 + $0xc0] sm:$0xff] %vm615_vm2, %v568_v14 }
  0xf7   : > { %1299 = vrot.lane.b32.xlu1 %v2929_v19, %s2806_s25  ;;  %1329 = vrot.lane.b32.xlu0 %v3022_v39, %s2806_s25  ;;  %v1848_v19 = vld [vmem:[%s4001_s1 + $0x20] sm:$0xf]  ;;  %v1847_v39 = vld [vmem:[%s4001_s1 + $0x18] sm:$0xff] }
  0xf8   : > { %2676 = vmatprep.subr.msk.mxu0 %vm1953_vm3, %v1848_v19  ;;  %2734 = vmatprep.subr.msk.mxu1 %vm1953_vm3, %v1848_v19 }
  0xf9   : > { %v574_v13 = vpop.permute.xlu1 %573  ;;  %v572_v30 = vpop.permute.xlu0 %571  ;;  %2677 = vmatpush3.msk.msra.mxu0 %vm1953_vm3, %v1848_v19  ;;  %2739 = vmatpush3.msk.msra.mxu1 %vm1953_vm3, %v1848_v19  ;;  %v2575_v19 = vld [vmem:[%s2853_s19 + $0x6a] sm:$0xff] }
  0xfa   : > { %643 = vst.msk [vmem:[#allocation2 + $0xd8] sm:$0xff] %vm615_vm2, %v574_v13  ;;  %642 = vst.msk [vmem:[#allocation2 + $0xd0] sm:$0xff] %vm615_vm2, %v572_v30  ;;  %2678 = vmatprep.subr.mxu0 %v1847_v39  ;;  %2735 = vmatprep.subr.mxu1 %v1847_v39  ;;  %v4029_v30 = vld [vmem:[#allocation9_spill] sm:$0xff] }
  0xfb   : > { %1490 = vrot.lane.b32.xlu1 %v2873_v5, %s2807_s26  ;;  %1331 = vrot.lane.b32.xlu0 %v3013_v38, %s2806_s25 }
  0xfc   : > { %2679 = vmatpush3.msra.mxu0 %v1847_v39  ;;  %2740 = vmatpush3.msra.mxu1 %v1847_v39 }
  0xfd   : > { %v578_v20 = vpop.permute.xlu1 %577  ;;  %v576_v3 = vpop.permute.xlu0 %575 }
  0xfe   : > { %645 = vst.msk [vmem:[#allocation2 + $0xe8] sm:$0xff] %vm615_vm2, %v578_v20  ;;  %644 = vst.msk [vmem:[#allocation2 + $0xe0] sm:$0xff] %vm615_vm2, %v576_v3 }
  0xff   : > { %944 = vrot.lane.b32.xlu1 %v3062_v47, %s2804_s23  ;;  %1522 = vrot.lane.b32.xlu0 %v3062_v47, %s2807_s26  ;;  %v1846_v47 = vld [vmem:[%s4001_s1 + $0x10] sm:$0xff] }
 0x100   : > { %2680 = vmatprep.subr.mxu0 %v1846_v47  ;;  %2736 = vmatprep.subr.mxu1 %v1846_v47 }
 0x101   : > { %v582_v5 = vpop.permute.xlu1 %581  ;;  %v580_v38 = vpop.permute.xlu0 %579  ;;  %2681 = vmatpush3.msra.mxu0 %v1846_v47  ;;  %2741 = vmatpush3.msra.mxu1 %v1846_v47 }
 0x102   : > { %647 = vst.msk [vmem:[#allocation2 + $0xf8] sm:$0xff] %vm615_vm2, %v582_v5  ;;  %646 = vst.msk [vmem:[#allocation2 + $0xf0] sm:$0xff] %vm615_vm2, %v580_v38  ;;  %2682 = vmatprep.subr.mxu0 %v1845_v59  ;;  %2737 = vmatprep.subr.mxu1 %v1845_v59 }
 0x103   : > { %1524 = vrot.lane.b32.xlu1 %v3059_v46, %s2807_s26  ;;  %1492 = vrot.lane.b32.xlu0 %v2870_v4, %s2807_s26  ;;  %v1844_v4 = vld [vmem:[%s4001_s1] sm:$0xff] }
 0x104   : > { %2683 = vmatpush3.msra.mxu0 %v1845_v59  ;;  %2742 = vmatpush3.msra.mxu1 %v1845_v59 }
 0x105   : > { %v718_v36 = vpop.permute.xlu1 %717  ;;  %v716_v37 = vpop.permute.xlu0 %715  ;;  %2684 = vmatprep.subr.mxu0 %v1844_v4  ;;  %2738 = vmatprep.subr.mxu1 %v1844_v4 }
 0x106   : > { %813 = vst.msk [vmem:[#allocation2 + $0x8] sm:$0xff] %vm811_vm4, %v718_v36  ;;  %812 = vst.msk [vmem:[#allocation2] sm:$0xff] %vm811_vm4, %v716_v37  ;;  %2685 = vmatpush3.msra.mxu0 %v1844_v4  ;;  %2743 = vmatpush3.msra.mxu1 %v1844_v4  ;;  %v4030_v36 = vld [vmem:[#allocation8_spill] sm:$0xff] }
 0x107   : > { %1715 = vrot.lane.b32.xlu1 %v3192_v55, %s2808_s8  ;;  %1683 = vrot.lane.b32.xlu0 %v3142_v18, %s2808_s8  ;;  %v2497_v37 = vld [vmem:[%s2853_s19 + $0x12a] sm:$0xff] }
 0x109   : > { %v722_v60 = vpop.permute.xlu1 %721  ;;  %v720_v12 = vpop.permute.xlu0 %719 }
 0x10a   : > { %815 = vst.msk [vmem:[#allocation2 + $0x18] sm:$0xff] %vm811_vm4, %v722_v60  ;;  %814 = vst.msk [vmem:[#allocation2 + $0x10] sm:$0xff] %vm811_vm4, %v720_v12 }
 0x10b   : > { %1105 = vrot.lane.b32.xlu1 %v3142_v18, %s2805_s24  ;;  %946 = vrot.lane.b32.xlu0 %v3059_v46, %s2804_s23 }
 0x10d   : > { %v726_v16 = vpop.permute.xlu1 %725  ;;  %v724_v61 = vpop.permute.xlu0 %723 }
 0x10e   : > { %817 = vst.msk [vmem:[#allocation2 + $0x28] sm:$0xff] %vm811_vm4, %v726_v16  ;;  %816 = vst.msk [vmem:[#allocation2 + $0x20] sm:$0xff] %vm811_vm4, %v724_v61  ;;  %v2544_v16 = vld [vmem:[%s2853_s19 + $0x79] sm:$0xff] }
 0x10f   : > { %1685 = vrot.lane.b32.xlu1 %v3139_v17, %s2808_s8  ;;  %1137 = vrot.lane.b32.xlu0 %v3192_v55, %s2805_s24 }
 0x111   : > { %v730_v63 = vpop.permute.xlu1 %729  ;;  %v728_v1 = vpop.permute.xlu0 %727 }
 0x112   : > { %819 = vst.msk [vmem:[#allocation2 + $0x38] sm:$0xff] %vm811_vm4, %v730_v63  ;;  %818 = vst.msk [vmem:[#allocation2 + $0x30] sm:$0xff] %vm811_vm4, %v728_v1  ;;  %v2466_v63 = vld [vmem:[%s2853_s19 + $0x139] sm:$0xff]  ;;  %v2561_v1 = vld [vmem:[%s2853_s19 + $0x141] sm:$0xff] }
 0x113   : > { %1107 = vrot.lane.b32.xlu1 %v3139_v17, %s2805_s24  ;;  %1717 = vrot.lane.b32.xlu0 %v3189_v54, %s2808_s8 }
 0x115   : > { %v734_v46 = vpop.permute.xlu1 %733  ;;  %v732_v18 = vpop.permute.xlu0 %731 }
 0x116   : > { %821 = vst.msk [vmem:[#allocation2 + $0x48] sm:$0xff] %vm811_vm4, %v734_v46  ;;  %820 = vst.msk [vmem:[#allocation2 + $0x40] sm:$0xff] %vm811_vm4, %v732_v18  ;;  %v2545_v46 = vld [vmem:[%s2853_s19 + $0x81] sm:$0xff] }
 0x117   : > { %1301 = vrot.lane.b32.xlu1 %v2948_v23, %s2806_s25  ;;  %1139 = vrot.lane.b32.xlu0 %v3189_v54, %s2805_s24 }
 0x119   : > { %v738_v55 = vpop.permute.xlu1 %737  ;;  %v736_v58 = vpop.permute.xlu0 %735 }
 0x11a   : > { %823 = vst.msk [vmem:[#allocation2 + $0x58] sm:$0xff] %vm811_vm4, %v738_v55  ;;  %822 = vst.msk [vmem:[#allocation2 + $0x50] sm:$0xff] %vm811_vm4, %v736_v58  ;;  %v2576_v58 = vld [vmem:[%s2853_s19 + $0x7a] sm:$0xff] }
 0x11b   : > { %1303 = vrot.lane.b32.xlu1 %v2943_v22, %s2806_s25  ;;  %1333 = vrot.lane.b32.xlu0 %v3028_v41, %s2806_s25 }
 0x11d   : > { %v742_v17 = vpop.permute.xlu1 %741  ;;  %v740_v62 = vpop.permute.xlu0 %739 }
 0x11e   : > { %825 = vst.msk [vmem:[#allocation2 + $0x68] sm:$0xff] %vm811_vm4, %v742_v17  ;;  %824 = vst.msk [vmem:[#allocation2 + $0x60] sm:$0xff] %vm811_vm4, %v740_v62 }
 0x11f   : > { %1494 = vrot.lane.b32.xlu1 %v2883_v7, %s2807_s26  ;;  %1335 = vrot.lane.b32.xlu0 %v3025_v40, %s2806_s25  ;;  %v4024_v7 = vld [vmem:[#allocation3_spill] sm:$0xff] }
 0x121   : > { %v746_v23 = vpop.permute.xlu1 %745  ;;  %v744_v54 = vpop.permute.xlu0 %743 }
 0x122   : > { %827 = vst.msk [vmem:[#allocation2 + $0x78] sm:$0xff] %vm811_vm4, %v746_v23  ;;  %826 = vst.msk [vmem:[#allocation2 + $0x70] sm:$0xff] %vm811_vm4, %v744_v54 }
 0x123   : > { %948 = vrot.lane.b32.xlu1 %v3082_v51, %s2804_s23  ;;  %1526 = vrot.lane.b32.xlu0 %v3082_v51, %s2807_s26  ;;  %v4025_v51 = vld [vmem:[#allocation7_spill] sm:$0xff] }
 0x125   : > { %v750_v22 = vpop.permute.xlu1 %749  ;;  %v748_v41 = vpop.permute.xlu0 %747 }
 0x126   : > { %829 = vst.msk [vmem:[#allocation2 + $0x88] sm:$0xff] %vm811_vm4, %v750_v22  ;;  %828 = vst.msk [vmem:[#allocation2 + $0x80] sm:$0xff] %vm811_vm4, %v748_v41  ;;  %v2577_v22 = vld [vmem:[%s2853_s19 + $0x82] sm:$0xff] }
 0x127   : > { %1528 = vrot.lane.b32.xlu1 %v4024_v7, %s2807_s26  ;;  %1496 = vrot.lane.b32.xlu0 %v2880_v6, %s2807_s26 }
 0x129   : > { %v754_v40 = vpop.permute.xlu1 %753  ;;  %v752_v29 = vpop.permute.xlu0 %751 }
 0x12a   : > { %831 = vst.msk [vmem:[#allocation2 + $0x98] sm:$0xff] %vm811_vm4, %v754_v40  ;;  %830 = vst.msk [vmem:[#allocation2 + $0x90] sm:$0xff] %vm811_vm4, %v752_v29  ;;  %v2593_v40 = vld [vmem:[%s2853_s19 + $0x142] sm:$0xff] }
 0x12b   : > { %1719 = vrot.lane.b32.xlu1 %v4025_v51, %s2808_s8  ;;  %1687 = vrot.lane.b32.xlu0 %v4026_v50, %s2808_s8 }
 0x12d   : > { %v758_v21 = vpop.permute.xlu1 %757  ;;  %v756_v56 = vpop.permute.xlu0 %755 }
 0x12e   : > { %833 = vst.msk [vmem:[#allocation2 + $0xa8] sm:$0xff] %vm811_vm4, %v758_v21  ;;  %832 = vst.msk [vmem:[#allocation2 + $0xa0] sm:$0xff] %vm811_vm4, %v756_v56 }
 0x12f   : > { %1109 = vrot.lane.b32.xlu1 %v4026_v50, %s2805_s24  ;;  %950 = vrot.lane.b32.xlu0 %v4024_v7, %s2804_s23  ;;  %v2514_v50 = vld [vmem:[%s2853_s19 + $0x90] sm:$0xff] }
 0x131   : > { %v762_v6 = vpop.permute.xlu1 %761  ;;  %v760_v57 = vpop.permute.xlu0 %759 }
 0x132   : > { %835 = vst.msk [vmem:[#allocation2 + $0xb8] sm:$0xff] %vm811_vm4, %v762_v6  ;;  %834 = vst.msk [vmem:[#allocation2 + $0xb0] sm:$0xff] %vm811_vm4, %v760_v57 }
 0x133   : > { %1689 = vrot.lane.b32.xlu1 %v4027_v28, %s2808_s8  ;;  %1141 = vrot.lane.b32.xlu0 %v4025_v51, %s2805_s24 }
 0x135   : > { %v766_v31 = vpop.permute.xlu1 %765  ;;  %v764_v0 = vpop.permute.xlu0 %763 }
 0x136   : > { %837 = vst.msk [vmem:[#allocation2 + $0xc8] sm:$0xff] %vm811_vm4, %v766_v31  ;;  %836 = vst.msk [vmem:[#allocation2 + $0xc0] sm:$0xff] %vm811_vm4, %v764_v0 }
 0x137   : > { %1111 = vrot.lane.b32.xlu1 %v4027_v28, %s2805_s24  ;;  %1721 = vrot.lane.b32.xlu0 %v4028_v2, %s2808_s8  ;;  %v2515_v28 = vld [vmem:[%s2853_s19 + $0x98] sm:$0xff] }
 0x139   : > { %v770_v32 = vpop.permute.xlu1 %769  ;;  %v768_v33 = vpop.permute.xlu0 %767 }
 0x13a   : > { %839 = vst.msk [vmem:[#allocation2 + $0xd8] sm:$0xff] %vm811_vm4, %v770_v32  ;;  %838 = vst.msk [vmem:[#allocation2 + $0xd0] sm:$0xff] %vm811_vm4, %v768_v33 }
 0x13b   : > { %1305 = vrot.lane.b32.xlu1 %v2954_v25, %s2806_s25  ;;  %1143 = vrot.lane.b32.xlu0 %v4028_v2, %s2805_s24  ;;  %v2546_v2 = vld [vmem:[%s2853_s19 + $0x91] sm:$0xff] }
 0x13d   : > { %v774_v34 = vpop.permute.xlu1 %773  ;;  %v772_v35 = vpop.permute.xlu0 %771 }
 0x13e   : > { %841 = vst.msk [vmem:[#allocation2 + $0xe8] sm:$0xff] %vm811_vm4, %v774_v34  ;;  %840 = vst.msk [vmem:[#allocation2 + $0xe0] sm:$0xff] %vm811_vm4, %v772_v35  ;;  %v2468_v35 = vld [vmem:[%s2853_s19 + $0x151] sm:$0xff] }
 0x13f   : > { %1307 = vrot.lane.b32.xlu1 %v2951_v24, %s2806_s25  ;;  %1337 = vrot.lane.b32.xlu0 %v3048_v45, %s2806_s25  ;;  %v2464_v24 = vld [vmem:[%s2853_s19 + $0x121] sm:$0xff]  ;;  %v2559_v45 = vld [vmem:[%s2853_s19 + $0x129] sm:$0xff] }
 0x141   : > { %v778_v25 = vpop.permute.xlu1 %777  ;;  %v776_v9 = vpop.permute.xlu0 %775 }
 0x142   : > { %843 = vst.msk [vmem:[#allocation2 + $0xf8] sm:$0xff] %vm811_vm4, %v778_v25  ;;  %842 = vst.msk [vmem:[#allocation2 + $0xf0] sm:$0xff] %vm811_vm4, %v776_v9  ;;  %v2563_v9 = vld [vmem:[%s2853_s19 + $0x159] sm:$0xff] }
 0x143   : > { %1498 = vrot.lane.b32.xlu1 %v2542_v8, %s2807_s26  ;;  %1339 = vrot.lane.b32.xlu0 %v3045_v44, %s2806_s25  ;;  %v2574_v44 = vld [vmem:[%s2853_s19 + $0x62] sm:$0xff] }
 0x145   : > { %v911_v10 = vpop.permute.xlu1 %910  ;;  %v909_v11 = vpop.permute.xlu0 %908 }
 0x146   : > { %1006 = vst.msk [vmem:[#allocation2 + $0x8] sm:$0xff] %vm1004_vm5, %v911_v10  ;;  %1005 = vst.msk [vmem:[#allocation2] sm:$0xff] %vm1004_vm5, %v909_v11  ;;  %v2594_v11 = vld [vmem:[%s2853_s19 + $0x152] sm:$0xff] }
 0x147   : > { %952 = vrot.lane.b32.xlu1 %v2464_v24, %s2804_s23  ;;  %1530 = vrot.lane.b32.xlu0 %v2464_v24, %s2807_s26  ;;  %v2547_v24 = vld [vmem:[%s2853_s19 + $0x99] sm:$0xff] }
 0x149   : > { %v915_v43 = vpop.permute.xlu1 %914  ;;  %v913_v42 = vpop.permute.xlu0 %912 }
 0x14a   : > { %1008 = vst.msk [vmem:[#allocation2 + $0x18] sm:$0xff] %vm1004_vm5, %v915_v43  ;;  %1007 = vst.msk [vmem:[#allocation2 + $0x10] sm:$0xff] %vm1004_vm5, %v913_v42 }
 0x14b   : > { %1532 = vrot.lane.b32.xlu1 %v2559_v45, %s2807_s26  ;;  %1500 = vrot.lane.b32.xlu0 %v2543_v15, %s2807_s26 }
 0x14d   : > { %v919_v14 = vpop.permute.xlu1 %918  ;;  %v917_v13 = vpop.permute.xlu0 %916 }
 0x14e   : > { %1010 = vst.msk [vmem:[#allocation2 + $0x28] sm:$0xff] %vm1004_vm5, %v919_v14  ;;  %1009 = vst.msk [vmem:[#allocation2 + $0x20] sm:$0xff] %vm1004_vm5, %v917_v13 }
 0x14f   : > { %1723 = vrot.lane.b32.xlu1 %v4029_v30, %s2808_s8  ;;  %1691 = vrot.lane.b32.xlu0 %v2574_v44, %s2808_s8 }
 0x151   : > { %v923_v20 = vpop.permute.xlu1 %922  ;;  %v921_v3 = vpop.permute.xlu0 %920 }
 0x152   : > { %1012 = vst.msk [vmem:[#allocation2 + $0x38] sm:$0xff] %vm1004_vm5, %v923_v20  ;;  %1011 = vst.msk [vmem:[#allocation2 + $0x30] sm:$0xff] %vm1004_vm5, %v921_v3  ;;  %v2579_v20 = vld [vmem:[%s2853_s19 + $0x9a] sm:$0xff] }
 0x153   : > { %1113 = vrot.lane.b32.xlu1 %v2574_v44, %s2805_s24  ;;  %954 = vrot.lane.b32.xlu0 %v2559_v45, %s2804_s23  ;;  %v2578_v45 = vld [vmem:[%s2853_s19 + $0x92] sm:$0xff] }
 0x155   : > { %v927_v5 = vpop.permute.xlu1 %926  ;;  %v925_v38 = vpop.permute.xlu0 %924 }
 0x156   : > { %1014 = vst.msk [vmem:[#allocation2 + $0x48] sm:$0xff] %vm1004_vm5, %v927_v5  ;;  %1013 = vst.msk [vmem:[#allocation2 + $0x40] sm:$0xff] %vm1004_vm5, %v925_v38 }
 0x157   : > { %1693 = vrot.lane.b32.xlu1 %v2575_v19, %s2808_s8  ;;  %1145 = vrot.lane.b32.xlu0 %v4029_v30, %s2805_s24  ;;  %v2595_v30 = vld [vmem:[%s2853_s19 + $0x15a] sm:$0xff] }
 0x159   : > { %v941_v39 = vpop.permute.xlu1 %940  ;;  %v929_v47 = vpop.permute.xlu0 %928 }
 0x15a   : > { %1021 = vst.msk [vmem:[#allocation2 + $0x80] sm:$0xff] %vm1004_vm5, %v941_v39  ;;  %1015 = vst.msk [vmem:[#allocation2 + $0x50] sm:$0xff] %vm1004_vm5, %v929_v47 }
 0x15b   : > { %1115 = vrot.lane.b32.xlu1 %v2575_v19, %s2805_s24  ;;  %1725 = vrot.lane.b32.xlu0 %v4030_v36, %s2808_s8  ;;  %v2532_v36 = vld [vmem:[%s2853_s19 + $0x168] sm:$0xff] }
 0x15d   : > { %v1102_v59 = vpop.permute.xlu1 %1101  ;;  %v943_v4 = vpop.permute.xlu0 %942 }
 0x15e   : > { %1198 = vst.msk [vmem:[#allocation2] sm:$0xff] %vm1197_vm6, %v1102_v59 }
 0x15f   : > { %1022 = vst.msk [vmem:[#allocation2 + $0x88] sm:$0xff] %vm1004_vm5, %v943_v4  ;;  %1309 = vrot.lane.b32.xlu1 %v2966_v27, %s2806_s25  ;;  %1147 = vrot.lane.b32.xlu0 %v2497_v37, %s2805_s24  ;;  %v2516_v37 = vld [vmem:[%s2853_s19 + $0xa8] sm:$0xff] }
 0x161   : > { %v1104_v60 = vpop.permute.xlu1 %1103  ;;  %v1134_v12 = vpop.permute.xlu0 %1133 }
 0x162   : > { %1199 = vst.msk [vmem:[#allocation2 + $0x8] sm:$0xff] %vm1197_vm6, %v1104_v60  ;;  %1214 = vst.msk [vmem:[#allocation2 + $0x80] sm:$0xff] %vm1197_vm6, %v1134_v12  ;;  %v2533_v60 = vld [vmem:[%s2853_s19 + $0x170] sm:$0xff] }
 0x163   : > { %1311 = vrot.lane.b32.xlu1 %v2963_v26, %s2806_s25  ;;  %1341 = vrot.lane.b32.xlu0 %v3068_v49, %s2806_s25  ;;  %v2517_v12 = vld [vmem:[%s2853_s19 + $0xb0] sm:$0xff] }
 0x165   : > { %v1298_v27 = vpop.permute.xlu1 %1297  ;;  %v1136_v61 = vpop.permute.xlu0 %1135 }
 0x166   : > { %1394 = vst.msk [vmem:[#allocation2] sm:$0xff] %vm1393_vm7, %v1298_v27 }
 0x167   : > { %1215 = vst.msk [vmem:[#allocation2 + $0x88] sm:$0xff] %vm1197_vm6, %v1136_v61  ;;  %1502 = vrot.lane.b32.xlu1 %v2544_v16, %s2807_s26  ;;  %1343 = vrot.lane.b32.xlu0 %v3065_v48, %s2806_s25  ;;  %v2592_v48 = vld [vmem:[%s2853_s19 + $0x13a] sm:$0xff] }
 0x169   : > { %v1300_v26 = vpop.permute.xlu1 %1299  ;;  %v1330_v49 = vpop.permute.xlu0 %1329 }
 0x16a   : > { %1395 = vst.msk [vmem:[#allocation2 + $0x8] sm:$0xff] %vm1393_vm7, %v1300_v26  ;;  %1410 = vst.msk [vmem:[#allocation2 + $0x80] sm:$0xff] %vm1393_vm7, %v1330_v49  ;;  %v2548_v26 = vld [vmem:[%s2853_s19 + $0xa9] sm:$0xff] }
 0x16b   : > { %956 = vrot.lane.b32.xlu1 %v2466_v63, %s2804_s23  ;;  %1534 = vrot.lane.b32.xlu0 %v2466_v63, %s2807_s26  ;;  %v2564_v63 = vld [vmem:[%s2853_s19 + $0x169] sm:$0xff] }
 0x16d   : > { %v1491_v18 = vpop.permute.xlu1 %1490  ;;  %v1332_v55 = vpop.permute.xlu0 %1331 }
 0x16e   : > { %1587 = vst.msk [vmem:[#allocation2] sm:$0xff] %vm1586_vm8, %v1491_v18 }
 0x16f   : > { %1411 = vst.msk [vmem:[#allocation2 + $0x88] sm:$0xff] %vm1393_vm7, %v1332_v55  ;;  %1536 = vrot.lane.b32.xlu1 %v2561_v1, %s2807_s26  ;;  %1504 = vrot.lane.b32.xlu0 %v2545_v46, %s2807_s26 }
 0x171   : > { %v945_v17 = vpop.permute.xlu1 %944  ;;  %v1523_v62 = vpop.permute.xlu0 %1522 }
 0x172   : > { %1023 = vst.msk [vmem:[#allocation2 + $0x90] sm:$0xff] %vm1004_vm5, %v945_v17 }
 0x173   : > { %1603 = vst.msk [vmem:[#allocation2 + $0x80] sm:$0xff] %vm1586_vm8, %v1523_v62  ;;  %1727 = vrot.lane.b32.xlu1 %v2592_v48, %s2808_s8  ;;  %1695 = vrot.lane.b32.xlu0 %v2576_v58, %s2808_s8 }
 0x175   : > { %v1525_v23 = vpop.permute.xlu1 %1524  ;;  %v1493_v54 = vpop.permute.xlu0 %1492 }
 0x176   : > { %1604 = vst.msk [vmem:[#allocation2 + $0x88] sm:$0xff] %vm1586_vm8, %v1525_v23  ;;  %1588 = vst.msk [vmem:[#allocation2 + $0x8] sm:$0xff] %vm1586_vm8, %v1493_v54  ;;  %v2596_v23 = vld [vmem:[%s2853_s19 + $0x16a] sm:$0xff] }
 0x177   : > { %1117 = vrot.lane.b32.xlu1 %v2576_v58, %s2805_s24  ;;  %958 = vrot.lane.b32.xlu0 %v2561_v1, %s2804_s23  ;;  %v2549_v58 = vld [vmem:[%s2853_s19 + $0xb1] sm:$0xff] }
 0x178   : > { %v2580_v54 = vld [vmem:[%s2853_s19 + $0xaa] sm:$0xff] }
 0x179   : > { %v1716_v41 = vpop.permute.xlu1 %1715  ;;  %v1684_v7 = vpop.permute.xlu0 %1683 }
 0x17a   : > { %1796 = vst.msk [vmem:[#allocation2 + $0x80] sm:$0xff] %vm1779_vm9, %v1716_v41  ;;  %1780 = vst.msk [vmem:[#allocation2] sm:$0xff] %vm1779_vm9, %v1684_v7 }
 0x17b   : > { %1697 = vrot.lane.b32.xlu1 %v2577_v22, %s2808_s8  ;;  %1149 = vrot.lane.b32.xlu0 %v2592_v48, %s2805_s24  ;;  %v2565_v48 = vld [vmem:[%s2853_s19 + $0x171] sm:$0xff] }
 0x17d   : > { %v1106_v29 = vpop.permute.xlu1 %1105  ;;  %v947_v51 = vpop.permute.xlu0 %946 }
 0x17e   : > { %1200 = vst.msk [vmem:[#allocation2 + $0x10] sm:$0xff] %vm1197_vm6, %v1106_v29 }
 0x17f   : > { %1024 = vst.msk [vmem:[#allocation2 + $0x98] sm:$0xff] %vm1004_vm5, %v947_v51  ;;  %1119 = vrot.lane.b32.xlu1 %v2577_v22, %s2805_s24  ;;  %1729 = vrot.lane.b32.xlu0 %v2593_v40, %s2808_s8 }
 0x181   : > { %v1686_v21 = vpop.permute.xlu1 %1685  ;;  %v1138_v56 = vpop.permute.xlu0 %1137  ;;  %v1812_v6 = vld [vmem:[#allocation2] sm:$0xff] }
 0x182   : > { %v1828_v57 = vld [vmem:[#allocation2 + $0x80] sm:$0xff]  ;;  %1781 = vst.msk [vmem:[#allocation2 + $0x8] sm:$0xff] %vm1779_vm9, %v1686_v21  ;;  %2686 = vmatprep.mubr.msk.f32.mxu0 %vm1856_vm10, %v1812_v6  ;;  %v2581_v21 = vld [vmem:[%s2853_s19 + $0xb2] sm:$0xff] }
 0x183   : > { %1216 = vst.msk [vmem:[#allocation2 + $0x90] sm:$0xff] %vm1197_vm6, %v1138_v56  ;;  %2710 = vmatprep.mubr.msk.f32.mxu1 %vm1856_vm10, %v1828_v57  ;;  %1313 = vrot.lane.b32.xlu1 %v2514_v50, %s2806_s25  ;;  %v2597_v50 = vld [vmem:[%s2853_s19 + $0x172] sm:$0xff] }
 0x184   : > { %1151 = vrot.lane.b32.xlu0 %v2593_v40, %s2805_s24 }
 0x185   : > { %v1108_v31 = vpop.permute.xlu1 %1107  ;;  %v1718_v0 = vpop.permute.xlu0 %1717 }
 0x186   : > { %1201 = vst.msk [vmem:[#allocation2 + $0x18] sm:$0xff] %vm1197_vm6, %v1108_v31 }
 0x187   : > { %1797 = vst.msk [vmem:[#allocation2 + $0x88] sm:$0xff] %vm1779_vm9, %v1718_v0  ;;  %1315 = vrot.lane.b32.xlu1 %v2515_v28, %s2806_s25 }
 0x188   : > { %1345 = vrot.lane.b32.xlu0 %v3088_v53, %s2806_s25 }
 0x189   : > { %v1302_v32 = vpop.permute.xlu1 %1301  ;;  %v1140_v33 = vpop.permute.xlu0 %1139  ;;  %v1813_v34 = vld [vmem:[#allocation2 + $0x8] sm:$0xff] }
 0x18a   : > { %1396 = vst.msk [vmem:[#allocation2 + $0x10] sm:$0xff] %vm1393_vm7, %v1302_v32  ;;  %2687 = vmatmul.mubr.msk.f32.vlgmr.msra.gmra.mxu0 %vm1856_vm10, %v1813_v34  ;;  %v2518_v32 = vld [vmem:[%s2853_s19 + $0xc0] sm:$0xff] }
 0x18b   : > { %1217 = vst.msk [vmem:[#allocation2 + $0x98] sm:$0xff] %vm1197_vm6, %v1140_v33  ;;  %1506 = vrot.lane.b32.xlu1 %v2546_v2, %s2807_s26  ;;  %v2534_v2 = vld [vmem:[%s2853_s19 + $0x180] sm:$0xff] }
 0x18c   : > { %1347 = vrot.lane.b32.xlu0 %v3085_v52, %s2806_s25 }
 0x18d   : > { %v1304_v8 = vpop.permute.xlu1 %1303  ;;  %v1334_v53 = vpop.permute.xlu0 %1333 }
 0x18e   : > { %v1829_v25 = vld [vmem:[#allocation2 + $0x88] sm:$0xff]  ;;  %1397 = vst.msk [vmem:[#allocation2 + $0x18] sm:$0xff] %vm1393_vm7, %v1304_v8  ;;  %1412 = vst.msk [vmem:[#allocation2 + $0x90] sm:$0xff] %vm1393_vm7, %v1334_v53 }
 0x18f   : > { %2711 = vmatmul.mubr.msk.f32.vlgmr.msra.gmra.mxu1 %vm1856_vm10, %v1829_v25  ;;  %960 = vrot.lane.b32.xlu1 %v2468_v35, %s2804_s23  ;;  %v2535_v8 = vld [vmem:[%s2853_s19 + $0x188] sm:$0xff] }
 0x190   : > { %1538 = vrot.lane.b32.xlu0 %v2468_v35, %s2807_s26  ;;  %v2519_v53 = vld [vmem:[%s2853_s19 + $0xc8] sm:$0xff] }
 0x191   : > { %v1495_v10 = vpop.permute.xlu1 %1494  ;;  %v1336_v52 = vpop.permute.xlu0 %1335 }
 0x192   : > { %1589 = vst.msk [vmem:[#allocation2 + $0x10] sm:$0xff] %vm1586_vm8, %v1495_v10  ;;  %v2566_v10 = vld [vmem:[%s2853_s19 + $0x181] sm:$0xff] }
 0x193   : > { %1413 = vst.msk [vmem:[#allocation2 + $0x98] sm:$0xff] %vm1393_vm7, %v1336_v52  ;;  %1540 = vrot.lane.b32.xlu1 %v2563_v9, %s2807_s26  ;;  %v2550_v52 = vld [vmem:[%s2853_s19 + $0xc1] sm:$0xff] }
 0x194   : > { %1508 = vrot.lane.b32.xlu0 %v2547_v24, %s2807_s26 }
 0x195   : > { %v949_v15 = vpop.permute.xlu1 %948  ;;  %v1527_v43 = vpop.permute.xlu0 %1526 }
 0x196   : > { %1025 = vst.msk [vmem:[#allocation2 + $0xa0] sm:$0xff] %vm1004_vm5, %v949_v15 }
 0x197   : > { %1605 = vst.msk [vmem:[#allocation2 + $0x90] sm:$0xff] %vm1586_vm8, %v1527_v43  ;;  %1731 = vrot.lane.b32.xlu1 %v2594_v11, %s2808_s8 }
 0x198   : > { %1699 = vrot.lane.b32.xlu0 %v2578_v45, %s2808_s8 }
 0x199   : > { %v1529_v42 = vpop.permute.xlu1 %1528  ;;  %v1497_v44 = vpop.permute.xlu0 %1496 }
 0x19a   : > { %1606 = vst.msk [vmem:[#allocation2 + $0x98] sm:$0xff] %vm1586_vm8, %v1529_v42  ;;  %1590 = vst.msk [vmem:[#allocation2 + $0x18] sm:$0xff] %vm1586_vm8, %v1497_v44  ;;  %v2567_v42 = vld [vmem:[%s2853_s19 + $0x189] sm:$0xff] }
 0x19b   : > { %962 = vrot.lane.b32.xlu1 %v2563_v9, %s2804_s23  ;;  %v2551_v44 = vld [vmem:[%s2853_s19 + $0xc9] sm:$0xff] }
 0x19c   : > { %930 = vrot.lane.b32.xlu0 %v2547_v24, %s2804_s23 }
 0x19d   : > { %v1720_v14 = vpop.permute.xlu1 %1719  ;;  %v1688_v13 = vpop.permute.xlu0 %1687 }
 0x19e   : > { %1798 = vst.msk [vmem:[#allocation2 + $0x90] sm:$0xff] %vm1779_vm9, %v1720_v14  ;;  %1782 = vst.msk [vmem:[#allocation2 + $0x10] sm:$0xff] %vm1779_vm9, %v1688_v13 }
 0x19f   : > { %1153 = vrot.lane.b32.xlu1 %v2594_v11, %s2805_s24 }
 0x1a0   : > { %1121 = vrot.lane.b32.xlu0 %v2578_v45, %s2805_s24 }
 0x1a1   : > { %v1110_v3 = vpop.permute.xlu1 %1109  ;;  %v951_v19 = vpop.permute.xlu0 %950 }
 0x1a2   : > { %1202 = vst.msk [vmem:[#allocation2 + $0x20] sm:$0xff] %vm1197_vm6, %v1110_v3 }
 0x1a3   : > { %1026 = vst.msk [vmem:[#allocation2 + $0xa8] sm:$0xff] %vm1004_vm5, %v951_v19  ;;  %1733 = vrot.lane.b32.xlu1 %v2595_v30, %s2808_s8 }
 0x1a4   : > { %1701 = vrot.lane.b32.xlu0 %v2579_v20, %s2808_s8 }
 0x1a5   : > { %v1690_v5 = vpop.permute.xlu1 %1689  ;;  %v1142_v38 = vpop.permute.xlu0 %1141  ;;  %v1814_v39 = vld [vmem:[#allocation2 + $0x10] sm:$0xff] }
 0x1a6   : > { %v1830_v47 = vld [vmem:[#allocation2 + $0x90] sm:$0xff]  ;;  %1783 = vst.msk [vmem:[#allocation2 + $0x18] sm:$0xff] %vm1779_vm9, %v1690_v5  ;;  %2689 = vmatprep.mubr.msk.f32.mxu0 %vm1856_vm10, %v1814_v39 }
 0x1a7   : > { %1218 = vst.msk [vmem:[#allocation2 + $0xa0] sm:$0xff] %vm1197_vm6, %v1142_v38  ;;  %2713 = vmatprep.mubr.msk.f32.mxu1 %vm1856_vm10, %v1830_v47  ;;  %1155 = vrot.lane.b32.xlu1 %v2595_v30, %s2805_s24  ;;  %v2598_v30 = vld [vmem:[%s2853_s19 + $0x182] sm:$0xff] }
 0x1a8   : > { %1123 = vrot.lane.b32.xlu0 %v2579_v20, %s2805_s24  ;;  %v2582_v20 = vld [vmem:[%s2853_s19 + $0xc2] sm:$0xff] }
 0x1a9   : > { %v1112_v59 = vpop.permute.xlu1 %1111  ;;  %v1722_v4 = vpop.permute.xlu0 %1721 }
 0x1aa   : > { %1203 = vst.msk [vmem:[#allocation2 + $0x28] sm:$0xff] %vm1197_vm6, %v1112_v59  ;;  %v2599_v59 = vld [vmem:[%s2853_s19 + $0x18a] sm:$0xff] }
 0x1ab   : > { %1799 = vst.msk [vmem:[#allocation2 + $0x98] sm:$0xff] %vm1779_vm9, %v1722_v4  ;;  %1349 = vrot.lane.b32.xlu1 %v2532_v36, %s2806_s25  ;;  %v2583_v4 = vld [vmem:[%s2853_s19 + $0xca] sm:$0xff] }
 0x1ac   : > { %1317 = vrot.lane.b32.xlu0 %v2516_v37, %s2806_s25 }
 0x1ad   : > { %v1306_v16 = vpop.permute.xlu1 %1305  ;;  %v1144_v27 = vpop.permute.xlu0 %1143  ;;  %v1815_v61 = vld [vmem:[#allocation2 + $0x18] sm:$0xff] }
 0x1ae   : > { %1398 = vst.msk [vmem:[#allocation2 + $0x20] sm:$0xff] %vm1393_vm7, %v1306_v16  ;;  %2690 = vmatmul.mubr.msk.f32.gmra.mxu0 %vm1856_vm10, %v1815_v61 }
 0x1af   : > { %1219 = vst.msk [vmem:[#allocation2 + $0xa8] sm:$0xff] %vm1197_vm6, %v1144_v27  ;;  %1351 = vrot.lane.b32.xlu1 %v2533_v60, %s2806_s25 }
 0x1b0   : > { %1319 = vrot.lane.b32.xlu0 %v2517_v12, %s2806_s25 }
 0x1b1   : > { %v1308_v49 = vpop.permute.xlu1 %1307  ;;  %v1338_v1 = vpop.permute.xlu0 %1337 }
 0x1b2   : > { %v1831_v46 = vld [vmem:[#allocation2 + $0x98] sm:$0xff]  ;;  %1399 = vst.msk [vmem:[#allocation2 + $0x28] sm:$0xff] %vm1393_vm7, %v1308_v49  ;;  %1414 = vst.msk [vmem:[#allocation2 + $0xa0] sm:$0xff] %vm1393_vm7, %v1338_v1 }
 0x1b3   : > { %2714 = vmatmul.mubr.msk.f32.gmra.mxu1 %vm1856_vm10, %v1831_v46  ;;  %1542 = vrot.lane.b32.xlu1 %v2564_v63, %s2807_s26 }
 0x1b4   : > { %1510 = vrot.lane.b32.xlu0 %v2548_v26, %s2807_s26 }
 0x1b5   : > { %v1499_v18 = vpop.permute.xlu1 %1498  ;;  %v1340_v55 = vpop.permute.xlu0 %1339 }
 0x1b6   : > { %1591 = vst.msk [vmem:[#allocation2 + $0x20] sm:$0xff] %vm1586_vm8, %v1499_v18  ;;  %v2537_v18 = vld [vmem:[%s2853_s19 + $0x1a0] sm:$0xff] }
 0x1b7   : > { %1415 = vst.msk [vmem:[#allocation2 + $0xa8] sm:$0xff] %vm1393_vm7, %v1340_v55  ;;  %964 = vrot.lane.b32.xlu1 %v2564_v63, %s2804_s23  ;;  %v2536_v63 = vld [vmem:[%s2853_s19 + $0x198] sm:$0xff]  ;;  %v2521_v55 = vld [vmem:[%s2853_s19 + $0xe0] sm:$0xff] }
 0x1b8   : > { %932 = vrot.lane.b32.xlu0 %v2548_v26, %s2804_s23  ;;  %v2520_v26 = vld [vmem:[%s2853_s19 + $0xd8] sm:$0xff] }
 0x1b9   : > { %v953_v17 = vpop.permute.xlu1 %952  ;;  %v1531_v62 = vpop.permute.xlu0 %1530 }
 0x1ba   : > { %1027 = vst.msk [vmem:[#allocation2 + $0xb0] sm:$0xff] %vm1004_vm5, %v953_v17  ;;  %v2568_v17 = vld [vmem:[%s2853_s19 + $0x199] sm:$0xff] }
 0x1bb   : > { %1607 = vst.msk [vmem:[#allocation2 + $0xa0] sm:$0xff] %vm1586_vm8, %v1531_v62  ;;  %1544 = vrot.lane.b32.xlu1 %v2565_v48, %s2807_s26  ;;  %v2552_v62 = vld [vmem:[%s2853_s19 + $0xd9] sm:$0xff] }
 0x1bc   : > { %1512 = vrot.lane.b32.xlu0 %v2549_v58, %s2807_s26 }
 0x1bd   : > { %v1533_v22 = vpop.permute.xlu1 %1532  ;;  %v1501_v41 = vpop.permute.xlu0 %1500 }
 0x1be   : > { %1608 = vst.msk [vmem:[#allocation2 + $0xa8] sm:$0xff] %vm1586_vm8, %v1533_v22  ;;  %1592 = vst.msk [vmem:[#allocation2 + $0x28] sm:$0xff] %vm1586_vm8, %v1501_v41  ;;  %v2569_v22 = vld [vmem:[%s2853_s19 + $0x1a1] sm:$0xff] }
 0x1bf   : > { %1735 = vrot.lane.b32.xlu1 %v2596_v23, %s2808_s8  ;;  %v2553_v41 = vld [vmem:[%s2853_s19 + $0xe1] sm:$0xff] }
 0x1c0   : > { %1703 = vrot.lane.b32.xlu0 %v2580_v54, %s2808_s8 }
 0x1c1   : > { %v1724_v7 = vpop.permute.xlu1 %1723  ;;  %v1692_v40 = vpop.permute.xlu0 %1691 }
 0x1c2   : > { %1800 = vst.msk [vmem:[#allocation2 + $0xa0] sm:$0xff] %vm1779_vm9, %v1724_v7  ;;  %1784 = vst.msk [vmem:[#allocation2 + $0x20] sm:$0xff] %vm1779_vm9, %v1692_v40 }
 0x1c3   : > { %966 = vrot.lane.b32.xlu1 %v2565_v48, %s2804_s23 }
 0x1c4   : > { %934 = vrot.lane.b32.xlu0 %v2549_v58, %s2804_s23 }
 0x1c5   : > { %v1114_v29 = vpop.permute.xlu1 %1113  ;;  %v955_v51 = vpop.permute.xlu0 %954 }
 0x1c6   : > { %1204 = vst.msk [vmem:[#allocation2 + $0x30] sm:$0xff] %vm1197_vm6, %v1114_v29  ;;  %v2600_v29 = vld [vmem:[%s2853_s19 + $0x19a] sm:$0xff] }
 0x1c7   : > { %1028 = vst.msk [vmem:[#allocation2 + $0xb8] sm:$0xff] %vm1004_vm5, %v955_v51  ;;  %1157 = vrot.lane.b32.xlu1 %v2596_v23, %s2805_s24  ;;  %v2584_v51 = vld [vmem:[%s2853_s19 + $0xda] sm:$0xff] }
 0x1c8   : > { %1125 = vrot.lane.b32.xlu0 %v2580_v54, %s2805_s24 }
 0x1c9   : > { %v1694_v56 = vpop.permute.xlu1 %1693  ;;  %v1146_v6 = vpop.permute.xlu0 %1145  ;;  %v1816_v57 = vld [vmem:[#allocation2 + $0x20] sm:$0xff] }
 0x1ca   : > { %v1832_v28 = vld [vmem:[#allocation2 + $0xa0] sm:$0xff]  ;;  %1785 = vst.msk [vmem:[#allocation2 + $0x28] sm:$0xff] %vm1779_vm9, %v1694_v56  ;;  %2692 = vmatprep.mubr.msk.f32.mxu0 %vm1856_vm10, %v1816_v57 }
 0x1cb   : > { %1220 = vst.msk [vmem:[#allocation2 + $0xb0] sm:$0xff] %vm1197_vm6, %v1146_v6  ;;  %2716 = vmatprep.mubr.msk.f32.mxu1 %vm1856_vm10, %v1832_v28  ;;  %1737 = vrot.lane.b32.xlu1 %v2597_v50, %s2808_s8  ;;  %v2601_v56 = vld [vmem:[%s2853_s19 + $0x1a2] sm:$0xff] }
 0x1cc   : > { %1705 = vrot.lane.b32.xlu0 %v2581_v21, %s2808_s8  ;;  %v2585_v6 = vld [vmem:[%s2853_s19 + $0xe2] sm:$0xff] }
 0x1cd   : > { %v1116_v31 = vpop.permute.xlu1 %1115  ;;  %v1726_v0 = vpop.permute.xlu0 %1725 }
 0x1ce   : > { %1205 = vst.msk [vmem:[#allocation2 + $0x38] sm:$0xff] %vm1197_vm6, %v1116_v31 }
 0x1cf   : > { %1801 = vst.msk [vmem:[#allocation2 + $0xa8] sm:$0xff] %vm1779_vm9, %v1726_v0  ;;  %1159 = vrot.lane.b32.xlu1 %v2597_v50, %s2805_s24 }
 0x1d0   : > { %1127 = vrot.lane.b32.xlu0 %v2581_v21, %s2805_s24 }
 0x1d1   : > { %v1310_v33 = vpop.permute.xlu1 %1309  ;;  %v1148_v34 = vpop.permute.xlu0 %1147  ;;  %v1817_v35 = vld [vmem:[#allocation2 + $0x28] sm:$0xff] }
 0x1d2   : > { %1400 = vst.msk [vmem:[#allocation2 + $0x30] sm:$0xff] %vm1393_vm7, %v1310_v33  ;;  %2693 = vmatmul.mubr.msk.f32.gmra.mxu0 %vm1856_vm10, %v1817_v35 }
 0x1d3   : > { %1221 = vst.msk [vmem:[#allocation2 + $0xb8] sm:$0xff] %vm1197_vm6, %v1148_v34  ;;  %1353 = vrot.lane.b32.xlu1 %v2534_v2, %s2806_s25 }
 0x1d4   : > { %1321 = vrot.lane.b32.xlu0 %v2518_v32, %s2806_s25 }
 0x1d5   : > { %v1312_v25 = vpop.permute.xlu1 %1311  ;;  %v1342_v9 = vpop.permute.xlu0 %1341 }
 0x1d6   : > { %v1833_v24 = vld [vmem:[#allocation2 + $0xa8] sm:$0xff]  ;;  %1401 = vst.msk [vmem:[#allocation2 + $0x38] sm:$0xff] %vm1393_vm7, %v1312_v25  ;;  %1416 = vst.msk [vmem:[#allocation2 + $0xb0] sm:$0xff] %vm1393_vm7, %v1342_v9 }
 0x1d7   : > { %2717 = vmatmul.mubr.msk.f32.gmra.mxu1 %vm1856_vm10, %v1833_v24  ;;  %1355 = vrot.lane.b32.xlu1 %v2535_v8, %s2806_s25 }
 0x1d8   : > { %1323 = vrot.lane.b32.xlu0 %v2519_v53, %s2806_s25 }
 0x1d9   : > { %v1503_v11 = vpop.permute.xlu1 %1502  ;;  %v1344_v45 = vpop.permute.xlu0 %1343 }
 0x1da   : > { %1593 = vst.msk [vmem:[#allocation2 + $0x30] sm:$0xff] %vm1586_vm8, %v1503_v11 }
 0x1db   : > { %1417 = vst.msk [vmem:[#allocation2 + $0xb8] sm:$0xff] %vm1393_vm7, %v1344_v45  ;;  %1546 = vrot.lane.b32.xlu1 %v2566_v10, %s2807_s26 }
 0x1dc   : > { %1514 = vrot.lane.b32.xlu0 %v2550_v52, %s2807_s26 }
 0x1dd   : > { %v957_v15 = vpop.permute.xlu1 %956  ;;  %v1535_v43 = vpop.permute.xlu0 %1534 }
 0x1de   : > { %1029 = vst.msk [vmem:[#allocation2 + $0xc0] sm:$0xff] %vm1004_vm5, %v957_v15 }
 0x1df   : > { %1609 = vst.msk [vmem:[#allocation2 + $0xb0] sm:$0xff] %vm1586_vm8, %v1535_v43  ;;  %968 = vrot.lane.b32.xlu1 %v2566_v10, %s2804_s23 }
 0x1e0   : > { %936 = vrot.lane.b32.xlu0 %v2550_v52, %s2804_s23 }
 0x1e1   : > { %v1537_v14 = vpop.permute.xlu1 %1536  ;;  %v1505_v13 = vpop.permute.xlu0 %1504 }
 0x1e2   : > { %1610 = vst.msk [vmem:[#allocation2 + $0xb8] sm:$0xff] %vm1586_vm8, %v1537_v14  ;;  %1594 = vst.msk [vmem:[#allocation2 + $0x38] sm:$0xff] %vm1586_vm8, %v1505_v13 }
 0x1e3   : > { %1548 = vrot.lane.b32.xlu1 %v2567_v42, %s2807_s26 }
 0x1e4   : > { %1516 = vrot.lane.b32.xlu0 %v2551_v44, %s2807_s26 }
 0x1e5   : > { %v1728_v3 = vpop.permute.xlu1 %1727  ;;  %v1696_v19 = vpop.permute.xlu0 %1695 }
 0x1e6   : > { %1802 = vst.msk [vmem:[#allocation2 + $0xb0] sm:$0xff] %vm1779_vm9, %v1728_v3  ;;  %1786 = vst.msk [vmem:[#allocation2 + $0x30] sm:$0xff] %vm1779_vm9, %v1696_v19 }
 0x1e7   : > { %1739 = vrot.lane.b32.xlu1 %v2598_v30, %s2808_s8 }
 0x1e8   : > { %1707 = vrot.lane.b32.xlu0 %v2582_v20, %s2808_s8 }
 0x1e9   : > { %v1118_v5 = vpop.permute.xlu1 %1117  ;;  %v959_v38 = vpop.permute.xlu0 %958 }
 0x1ea   : > { %1206 = vst.msk [vmem:[#allocation2 + $0x40] sm:$0xff] %vm1197_vm6, %v1118_v5 }
 0x1eb   : > { %1030 = vst.msk [vmem:[#allocation2 + $0xc8] sm:$0xff] %vm1004_vm5, %v959_v38  ;;  %970 = vrot.lane.b32.xlu1 %v2567_v42, %s2804_s23 }
 0x1ec   : > { %938 = vrot.lane.b32.xlu0 %v2551_v44, %s2804_s23 }
 0x1ed   : > { %v1698_v39 = vpop.permute.xlu1 %1697  ;;  %v1150_v47 = vpop.permute.xlu0 %1149  ;;  %v1818_v36 = vld [vmem:[#allocation2 + $0x30] sm:$0xff] }
 0x1ee   : > { %v1834_v37 = vld [vmem:[#allocation2 + $0xb0] sm:$0xff]  ;;  %1787 = vst.msk [vmem:[#allocation2 + $0x38] sm:$0xff] %vm1779_vm9, %v1698_v39  ;;  %2695 = vmatprep.mubr.msk.f32.mxu0 %vm1856_vm10, %v1818_v36 }
 0x1ef   : > { %1222 = vst.msk [vmem:[#allocation2 + $0xc0] sm:$0xff] %vm1197_vm6, %v1150_v47  ;;  %2719 = vmatprep.mubr.msk.f32.mxu1 %vm1856_vm10, %v1834_v37  ;;  %1161 = vrot.lane.b32.xlu1 %v2598_v30, %s2805_s24 }
 0x1f0   : > { %1129 = vrot.lane.b32.xlu0 %v2582_v20, %s2805_s24 }
 0x1f1   : > { %v1120_v60 = vpop.permute.xlu1 %1119  ;;  %v1730_v12 = vpop.permute.xlu0 %1729 }
 0x1f2   : > { %1207 = vst.msk [vmem:[#allocation2 + $0x48] sm:$0xff] %vm1197_vm6, %v1120_v60 }
 0x1f3   : > { %1803 = vst.msk [vmem:[#allocation2 + $0xb8] sm:$0xff] %vm1779_vm9, %v1730_v12  ;;  %1741 = vrot.lane.b32.xlu1 %v2599_v59, %s2808_s8 }
 0x1f4   : > { %1709 = vrot.lane.b32.xlu0 %v2583_v4, %s2808_s8 }
 0x1f5   : > { %v1314_v16 = vpop.permute.xlu1 %1313  ;;  %v1819_v61 = vld [vmem:[#allocation2 + $0x38] sm:$0xff] }
 0x1f6   : > { %v1152_v27 = vpop.permute.xlu0 %1151  ;;  %1402 = vst.msk [vmem:[#allocation2 + $0x40] sm:$0xff] %vm1393_vm7, %v1314_v16  ;;  %2696 = vmatmul.mubr.msk.f32.gmra.mxu0 %vm1856_vm10, %v1819_v61  ;;  %v3849_v16 = vld [vmem:[%s4002_s2] ss:$0 sm:$0xff] }
 0x1f7   : > { %1223 = vst.msk [vmem:[#allocation2 + $0xc8] sm:$0xff] %vm1197_vm6, %v1152_v27  ;;  %1163 = vrot.lane.b32.xlu1 %v2599_v59, %s2805_s24 }
 0x1f8   : > { %1131 = vrot.lane.b32.xlu0 %v2583_v4, %s2805_s24 }
 0x1f9   : > { %v1316_v49 = vpop.permute.xlu1 %1315 }
 0x1fa   : > { %v1346_v1 = vpop.permute.xlu0 %1345  ;;  %v1835_v46 = vld [vmem:[#allocation2 + $0xb8] sm:$0xff]  ;;  %1403 = vst.msk [vmem:[#allocation2 + $0x48] sm:$0xff] %vm1393_vm7, %v1316_v49 }
 0x1fb   : > { %1418 = vst.msk [vmem:[#allocation2 + $0xc0] sm:$0xff] %vm1393_vm7, %v1346_v1  ;;  %2720 = vmatmul.mubr.msk.f32.gmra.mxu1 %vm1856_vm10, %v1835_v46  ;;  %1357 = vrot.lane.b32.xlu1 %v2536_v63, %s2806_s25 }
 0x1fc   : > { %1325 = vrot.lane.b32.xlu0 %v2520_v26, %s2806_s25 }
 0x1fd   : > { %v1507_v48 = vpop.permute.xlu1 %1506 }
 0x1fe   : > { %v1348_v58 = vpop.permute.xlu0 %1347  ;;  %1595 = vst.msk [vmem:[#allocation2 + $0x40] sm:$0xff] %vm1586_vm8, %v1507_v48 }
 0x1ff   : > { %1419 = vst.msk [vmem:[#allocation2 + $0xc8] sm:$0xff] %vm1393_vm7, %v1348_v58  ;;  %1359 = vrot.lane.b32.xlu1 %v2537_v18, %s2806_s25 }
 0x200   : > { %1327 = vrot.lane.b32.xlu0 %v2521_v55, %s2806_s25 }
 0x201   : > { %v961_v23 = vpop.permute.xlu1 %960 }
 0x202   : > { %v1539_v54 = vpop.permute.xlu0 %1538  ;;  %1031 = vst.msk [vmem:[#allocation2 + $0xd0] sm:$0xff] %vm1004_vm5, %v961_v23 }
 0x203   : > { %1611 = vst.msk [vmem:[#allocation2 + $0xc0] sm:$0xff] %vm1586_vm8, %v1539_v54  ;;  %1550 = vrot.lane.b32.xlu1 %v2568_v17, %s2807_s26 }
 0x204   : > { %1518 = vrot.lane.b32.xlu0 %v2552_v62, %s2807_s26 }
 0x205   : > { %v1541_v7 = vpop.permute.xlu1 %1540 }
 0x206   : > { %v1509_v40 = vpop.permute.xlu0 %1508  ;;  %1612 = vst.msk [vmem:[#allocation2 + $0xc8] sm:$0xff] %vm1586_vm8, %v1541_v7 }
 0x207   : > { %1596 = vst.msk [vmem:[#allocation2 + $0x48] sm:$0xff] %vm1586_vm8, %v1509_v40  ;;  %1552 = vrot.lane.b32.xlu1 %v2569_v22, %s2807_s26 }
 0x208   : > { %1520 = vrot.lane.b32.xlu0 %v2553_v41, %s2807_s26 }
 0x209   : > { %v1732_v50 = vpop.permute.xlu1 %1731 }
 0x20a   : > { %v1700_v21 = vpop.permute.xlu0 %1699  ;;  %1804 = vst.msk [vmem:[#allocation2 + $0xc0] sm:$0xff] %vm1779_vm9, %v1732_v50 }
 0x20b   : > { %1788 = vst.msk [vmem:[#allocation2 + $0x40] sm:$0xff] %vm1779_vm9, %v1700_v21  ;;  %1743 = vrot.lane.b32.xlu1 %v2600_v29, %s2808_s8 }
 0x20c   : > { %1711 = vrot.lane.b32.xlu0 %v2584_v51, %s2808_s8 }
 0x20d   : > { %v963_v57 = vpop.permute.xlu1 %962 }
 0x20e   : > { %v931_v28 = vpop.permute.xlu0 %930  ;;  %1032 = vst.msk [vmem:[#allocation2 + $0xd8] sm:$0xff] %vm1004_vm5, %v963_v57 }
 0x20f   : > { %1016 = vst.msk [vmem:[#allocation2 + $0x58] sm:$0xff] %vm1004_vm5, %v931_v28  ;;  %1745 = vrot.lane.b32.xlu1 %v2601_v56, %s2808_s8 }
 0x210   : > { %1713 = vrot.lane.b32.xlu0 %v2585_v6, %s2808_s8 }
 0x211   : > { %v1154_v31 = vpop.permute.xlu1 %1153  ;;  %v1836_v32 = vld [vmem:[#allocation2 + $0xc0] sm:$0xff] }
 0x212   : > { %v1122_v0 = vpop.permute.xlu0 %1121  ;;  %v1820_v2 = vld [vmem:[#allocation2 + $0x40] sm:$0xff]  ;;  %1224 = vst.msk [vmem:[#allocation2 + $0xd0] sm:$0xff] %vm1197_vm6, %v1154_v31  ;;  %2722 = vmatprep.mubr.msk.f32.mxu1 %vm1856_vm10, %v1836_v32 }
 0x213   : > { %1208 = vst.msk [vmem:[#allocation2 + $0x50] sm:$0xff] %vm1197_vm6, %v1122_v0  ;;  %2698 = vmatprep.mubr.msk.f32.mxu0 %vm1856_vm10, %v1820_v2 }
 0x215   : > { %v1734_v33 = vpop.permute.xlu1 %1733 }
 0x216   : > { %v1702_v34 = vpop.permute.xlu0 %1701  ;;  %1805 = vst.msk [vmem:[#allocation2 + $0xc8] sm:$0xff] %vm1779_vm9, %v1734_v33 }
 0x217   : > { %1789 = vst.msk [vmem:[#allocation2 + $0x48] sm:$0xff] %vm1779_vm9, %v1702_v34 }
 0x219   : > { %v1156_v35 = vpop.permute.xlu1 %1155 }
 0x21a   : > { %v1124_v8 = vpop.permute.xlu0 %1123  ;;  %1225 = vst.msk [vmem:[#allocation2 + $0xd8] sm:$0xff] %vm1197_vm6, %v1156_v35 }
 0x21b   : > { %1209 = vst.msk [vmem:[#allocation2 + $0x58] sm:$0xff] %vm1197_vm6, %v1124_v8 }
 0x21d   : > { %v1350_v53 = vpop.permute.xlu1 %1349  ;;  %v1837_v24 = vld [vmem:[#allocation2 + $0xc8] sm:$0xff] }
 0x21e   : > { %v1318_v25 = vpop.permute.xlu0 %1317  ;;  %v1821_v9 = vld [vmem:[#allocation2 + $0x48] sm:$0xff]  ;;  %1420 = vst.msk [vmem:[#allocation2 + $0xd0] sm:$0xff] %vm1393_vm7, %v1350_v53  ;;  %2723 = vmatmul.mubr.msk.f32.gmra.mxu1 %vm1856_vm10, %v1837_v24 }
 0x21f   : > { %1404 = vst.msk [vmem:[#allocation2 + $0x50] sm:$0xff] %vm1393_vm7, %v1318_v25  ;;  %2699 = vmatmul.mubr.msk.f32.gmra.mxu0 %vm1856_vm10, %v1821_v9 }
 0x221   : > { %v1352_v10 = vpop.permute.xlu1 %1351 }
 0x222   : > { %v1320_v52 = vpop.permute.xlu0 %1319  ;;  %1421 = vst.msk [vmem:[#allocation2 + $0xd8] sm:$0xff] %vm1393_vm7, %v1352_v10 }
 0x223   : > { %1405 = vst.msk [vmem:[#allocation2 + $0x58] sm:$0xff] %vm1393_vm7, %v1320_v52 }
 0x225   : > { %v1543_v11 = vpop.permute.xlu1 %1542 }
 0x226   : > { %v1511_v45 = vpop.permute.xlu0 %1510  ;;  %1613 = vst.msk [vmem:[#allocation2 + $0xd0] sm:$0xff] %vm1586_vm8, %v1543_v11 }
 0x227   : > { %1597 = vst.msk [vmem:[#allocation2 + $0x50] sm:$0xff] %vm1586_vm8, %v1511_v45 }
 0x229   : > { %v965_v15 = vpop.permute.xlu1 %964 }
 0x22a   : > { %v933_v43 = vpop.permute.xlu0 %932  ;;  %1033 = vst.msk [vmem:[#allocation2 + $0xe0] sm:$0xff] %vm1004_vm5, %v965_v15 }
 0x22b   : > { %1017 = vst.msk [vmem:[#allocation2 + $0x60] sm:$0xff] %vm1004_vm5, %v933_v43 }
 0x22d   : > { %v1545_v42 = vpop.permute.xlu1 %1544 }
 0x22e   : > { %v1513_v44 = vpop.permute.xlu0 %1512  ;;  %1614 = vst.msk [vmem:[#allocation2 + $0xd8] sm:$0xff] %vm1586_vm8, %v1545_v42 }
 0x22f   : > { %1598 = vst.msk [vmem:[#allocation2 + $0x58] sm:$0xff] %vm1586_vm8, %v1513_v44 }
 0x231   : > { %v1736_v14 = vpop.permute.xlu1 %1735 }
 0x232   : > { %v1704_v13 = vpop.permute.xlu0 %1703  ;;  %1806 = vst.msk [vmem:[#allocation2 + $0xd0] sm:$0xff] %vm1779_vm9, %v1736_v14 }
 0x233   : > { %1790 = vst.msk [vmem:[#allocation2 + $0x50] sm:$0xff] %vm1779_vm9, %v1704_v13 }
 0x235   : > { %v967_v30 = vpop.permute.xlu1 %966 }
 0x236   : > { %v935_v20 = vpop.permute.xlu0 %934  ;;  %1034 = vst.msk [vmem:[#allocation2 + $0xe8] sm:$0xff] %vm1004_vm5, %v967_v30 }
 0x237   : > { %1018 = vst.msk [vmem:[#allocation2 + $0x68] sm:$0xff] %vm1004_vm5, %v935_v20 }
 0x239   : > { %v1158_v3 = vpop.permute.xlu1 %1157  ;;  %v1838_v38 = vld [vmem:[#allocation2 + $0xd0] sm:$0xff] }
 0x23a   : > { %v1126_v19 = vpop.permute.xlu0 %1125  ;;  %v1822_v5 = vld [vmem:[#allocation2 + $0x50] sm:$0xff]  ;;  %1226 = vst.msk [vmem:[#allocation2 + $0xe0] sm:$0xff] %vm1197_vm6, %v1158_v3  ;;  %2725 = vmatprep.mubr.msk.f32.mxu1 %vm1856_vm10, %v1838_v38 }
 0x23b   : > { %1210 = vst.msk [vmem:[#allocation2 + $0x60] sm:$0xff] %vm1197_vm6, %v1126_v19  ;;  %2701 = vmatprep.mubr.msk.f32.mxu0 %vm1856_vm10, %v1822_v5 }
 0x23d   : > { %v1738_v39 = vpop.permute.xlu1 %1737 }
 0x23e   : > { %v1706_v47 = vpop.permute.xlu0 %1705  ;;  %1807 = vst.msk [vmem:[#allocation2 + $0xd8] sm:$0xff] %vm1779_vm9, %v1738_v39 }
 0x23f   : > { %1791 = vst.msk [vmem:[#allocation2 + $0x58] sm:$0xff] %vm1779_vm9, %v1706_v47 }
 0x241   : > { %v1160_v36 = vpop.permute.xlu1 %1159 }
 0x242   : > { %v1128_v37 = vpop.permute.xlu0 %1127  ;;  %1227 = vst.msk [vmem:[#allocation2 + $0xe8] sm:$0xff] %vm1197_vm6, %v1160_v36 }
 0x243   : > { %1211 = vst.msk [vmem:[#allocation2 + $0x68] sm:$0xff] %vm1197_vm6, %v1128_v37 }
 0x245   : > { %v1354_v59 = vpop.permute.xlu1 %1353  ;;  %v1839_v12 = vld [vmem:[#allocation2 + $0xd8] sm:$0xff] }
 0x246   : > { %v1322_v4 = vpop.permute.xlu0 %1321  ;;  %v1823_v60 = vld [vmem:[#allocation2 + $0x58] sm:$0xff]  ;;  %1422 = vst.msk [vmem:[#allocation2 + $0xe0] sm:$0xff] %vm1393_vm7, %v1354_v59  ;;  %2726 = vmatmul.mubr.msk.f32.gmra.mxu1 %vm1856_vm10, %v1839_v12 }
 0x247   : > { %1406 = vst.msk [vmem:[#allocation2 + $0x60] sm:$0xff] %vm1393_vm7, %v1322_v4  ;;  %2702 = vmatmul.mubr.msk.f32.gmra.mxu0 %vm1856_vm10, %v1823_v60 }
 0x249   : > { %v1356_v27 = vpop.permute.xlu1 %1355 }
 0x24a   : > { %v1324_v61 = vpop.permute.xlu0 %1323  ;;  %1423 = vst.msk [vmem:[#allocation2 + $0xe8] sm:$0xff] %vm1393_vm7, %v1356_v27  ;;  %v2688_v63 = vpop.f32.mrf.mxu0 }
 0x24b   : > { %1407 = vst.msk [vmem:[#allocation2 + $0x68] sm:$0xff] %vm1393_vm7, %v1324_v61  ;;  %v2029_v26 = vadd.f32 %v2688_v63, %v3849_v16 }
 0x24c   : > { %v2023_v49 = vpop.f32.mrf.mxu0 }
 0x24d   : > { %vm2183_vm11 = vcmp.ge.f32.partialorder %v2029_v26, 0.0  ;;  %v2215_v1 = vmul.f32 0.01, %v2029_v26  ;;  %v2024_v46 = vadd.f32 %v3849_v16, %v2023_v49  ;;  %v1547_v18 = vpop.permute.xlu1 %1546 }
 0x24e   : > { %v1515_v55 = vpop.permute.xlu0 %1514  ;;  %1615 = vst.msk [vmem:[#allocation2 + $0xe0] sm:$0xff] %vm1586_vm8, %v1547_v18 }
 0x24f   : > { %1599 = vst.msk [vmem:[#allocation2 + $0x60] sm:$0xff] %vm1586_vm8, %v1515_v55  ;;  %v2712_v48 = vpop.f32.mrf.mxu1  ;;  %v2247_v58 = vsel %vm2183_vm11, %v2029_v26, %v2215_v1  ;;  %vm2182_vm13 = vcmp.ge.f32.partialorder %v2024_v46, 0.0  ;;  %v2214_v17 = vmul.f32 0.01, %v2024_v46 }
 0x250   : > { %v2109_v62 = vadd.f32 %v2712_v48, %v3849_v16  ;;  %2280 = vst.msk [vmem:[%s3858_s20 + $0x8] sm:$0xff] %vm2278_vm12, %v2247_v58 }
 0x251   : > { %v2103_v23 = vpop.f32.mrf.mxu1  ;;  %v2246_v54 = vsel %vm2182_vm13, %v2024_v46, %v2214_v17  ;;  %v969_v7 = vpop.permute.xlu1 %968 }
 0x252   : > { %vm2199_vm14 = vcmp.ge.f32.partialorder %v2109_v62, 0.0  ;;  %v2231_v22 = vmul.f32 0.01, %v2109_v62  ;;  %v2104_v41 = vadd.f32 %v3849_v16, %v2103_v23  ;;  %v937_v40 = vpop.permute.xlu0 %936  ;;  %2279 = vst.msk [vmem:[%s3858_s20] sm:$0xff] %vm2278_vm12, %v2246_v54 }
 0x253   : > { %1035 = vst.msk [vmem:[#allocation2 + $0xf0] sm:$0xff] %vm1004_vm5, %v969_v7  ;;  %1019 = vst.msk [vmem:[#allocation2 + $0x70] sm:$0xff] %vm1004_vm5, %v937_v40 }
 0x254   : > { %v2263_v29 = vsel %vm2199_vm14, %v2109_v62, %v2231_v22  ;;  %vm2198_vm15 = vcmp.ge.f32.partialorder %v2104_v41, 0.0  ;;  %v2230_v51 = vmul.f32 0.01, %v2104_v41 }
 0x255   : > { %2296 = vst.msk [vmem:[%s3858_s20 + $0x88] sm:$0xff] %vm2278_vm12, %v2263_v29  ;;  %v1549_v21 = vpop.permute.xlu1 %1548 }
 0x256   : > { %v2262_v50 = vsel %vm2198_vm15, %v2104_v41, %v2230_v51  ;;  %v1517_v56 = vpop.permute.xlu0 %1516  ;;  %1616 = vst.msk [vmem:[#allocation2 + $0xe8] sm:$0xff] %vm1586_vm8, %v1549_v21 }
 0x257   : > { %2295 = vst.msk [vmem:[%s3858_s20 + $0x80] sm:$0xff] %vm2278_vm12, %v2262_v50 }
 0x258   : > { %1600 = vst.msk [vmem:[#allocation2 + $0x68] sm:$0xff] %vm1586_vm8, %v1517_v56 }
 0x259   : > { %v1740_v6 = vpop.permute.xlu1 %1739 }
 0x25a   : > { %v1708_v57 = vpop.permute.xlu0 %1707  ;;  %1808 = vst.msk [vmem:[#allocation2 + $0xe0] sm:$0xff] %vm1779_vm9, %v1740_v6 }
 0x25b   : > { %1792 = vst.msk [vmem:[#allocation2 + $0x60] sm:$0xff] %vm1779_vm9, %v1708_v57 }
 0x25d   : > { %v971_v28 = vpop.permute.xlu1 %970 }
 0x25e   : > { %v939_v31 = vpop.permute.xlu0 %938  ;;  %1036 = vst.msk [vmem:[#allocation2 + $0xf8] sm:$0xff] %vm1004_vm5, %v971_v28 }
 0x25f   : > { %1020 = vst.msk [vmem:[#allocation2 + $0x78] sm:$0xff] %vm1004_vm5, %v939_v31 }
 0x261   : > { %v1162_v0 = vpop.permute.xlu1 %1161  ;;  %v1840_v33 = vld [vmem:[#allocation2 + $0xe0] sm:$0xff] }
 0x262   : > { %v1130_v2 = vpop.permute.xlu0 %1129  ;;  %v1824_v32 = vld [vmem:[#allocation2 + $0x60] sm:$0xff]  ;;  %1228 = vst.msk [vmem:[#allocation2 + $0xf0] sm:$0xff] %vm1197_vm6, %v1162_v0  ;;  %2728 = vmatprep.mubr.msk.f32.mxu1 %vm1856_vm10, %v1840_v33 }
 0x263   : > { %1212 = vst.msk [vmem:[#allocation2 + $0x70] sm:$0xff] %vm1197_vm6, %v1130_v2  ;;  %2704 = vmatprep.mubr.msk.f32.mxu0 %vm1856_vm10, %v1824_v32 }
 0x265   : > { %v1742_v34 = vpop.permute.xlu1 %1741 }
 0x266   : > { %v1710_v35 = vpop.permute.xlu0 %1709  ;;  %1809 = vst.msk [vmem:[#allocation2 + $0xe8] sm:$0xff] %vm1779_vm9, %v1742_v34 }
 0x267   : > { %1793 = vst.msk [vmem:[#allocation2 + $0x68] sm:$0xff] %vm1779_vm9, %v1710_v35 }
 0x269   : > { %v1164_v8 = vpop.permute.xlu1 %1163 }
 0x26a   : > { %v1132_v53 = vpop.permute.xlu0 %1131  ;;  %1229 = vst.msk [vmem:[#allocation2 + $0xf8] sm:$0xff] %vm1197_vm6, %v1164_v8 }
 0x26b   : > { %1213 = vst.msk [vmem:[#allocation2 + $0x78] sm:$0xff] %vm1197_vm6, %v1132_v53 }
 0x26d   : > { %v1358_v25 = vpop.permute.xlu1 %1357  ;;  %v1841_v10 = vld [vmem:[#allocation2 + $0xe8] sm:$0xff] }
 0x26e   : > { %v1326_v9 = vpop.permute.xlu0 %1325  ;;  %v1825_v24 = vld [vmem:[#allocation2 + $0x68] sm:$0xff]  ;;  %1424 = vst.msk [vmem:[#allocation2 + $0xf0] sm:$0xff] %vm1393_vm7, %v1358_v25  ;;  %v2691_v52 = vpop.f32.mrf.mxu0  ;;  %2729 = vmatmul.mubr.msk.f32.gmra.mxu1 %vm1856_vm10, %v1841_v10 }
 0x26f   : > { %1408 = vst.msk [vmem:[#allocation2 + $0x70] sm:$0xff] %vm1393_vm7, %v1326_v9  ;;  %2705 = vmatmul.mubr.msk.f32.gmra.mxu0 %vm1856_vm10, %v1825_v24  ;;  %v2039_v11 = vadd.f32 %v2691_v52, %v3849_v16 }
 0x270   : > { %v2033_v45 = vpop.f32.mrf.mxu0 }
 0x271   : > { %vm2185_vm0 = vcmp.ge.f32.partialorder %v2039_v11, 0.0  ;;  %v2217_v15 = vmul.f32 0.01, %v2039_v11  ;;  %v2034_v43 = vadd.f32 %v3849_v16, %v2033_v45  ;;  %v1360_v42 = vpop.permute.xlu1 %1359 }
 0x272   : > { %v1328_v44 = vpop.permute.xlu0 %1327  ;;  %1425 = vst.msk [vmem:[#allocation2 + $0xf8] sm:$0xff] %vm1393_vm7, %v1360_v42 }
 0x273   : > { %1409 = vst.msk [vmem:[#allocation2 + $0x78] sm:$0xff] %vm1393_vm7, %v1328_v44  ;;  %v2715_v14 = vpop.f32.mrf.mxu1  ;;  %v2249_v13 = vsel %vm2185_vm0, %v2039_v11, %v2217_v15  ;;  %vm2184_vm1 = vcmp.ge.f32.partialorder %v2034_v43, 0.0  ;;  %v2216_v30 = vmul.f32 0.01, %v2034_v43 }
 0x274   : > { %v2119_v20 = vadd.f32 %v2715_v14, %v3849_v16  ;;  %2282 = vst.msk [vmem:[%s3858_s20 + $0x18] sm:$0xff] %vm2278_vm12, %v2249_v13 }
 0x275   : > { %v2113_v3 = vpop.f32.mrf.mxu1  ;;  %v2248_v19 = vsel %vm2184_vm1, %v2034_v43, %v2216_v30  ;;  %v1551_v39 = vpop.permute.xlu1 %1550 }
 0x276   : > { %vm2201_vm2 = vcmp.ge.f32.partialorder %v2119_v20, 0.0  ;;  %v2233_v5 = vmul.f32 0.01, %v2119_v20  ;;  %v2114_v38 = vadd.f32 %v3849_v16, %v2113_v3  ;;  %v1519_v47 = vpop.permute.xlu0 %1518  ;;  %2281 = vst.msk [vmem:[%s3858_s20 + $0x10] sm:$0xff] %vm2278_vm12, %v2248_v19 }
 0x277   : > { %1617 = vst.msk [vmem:[#allocation2 + $0xf0] sm:$0xff] %vm1586_vm8, %v1551_v39  ;;  %1601 = vst.msk [vmem:[#allocation2 + $0x70] sm:$0xff] %vm1586_vm8, %v1519_v47 }
 0x278   : > { %v2265_v36 = vsel %vm2201_vm2, %v2119_v20, %v2233_v5  ;;  %vm2200_vm3 = vcmp.ge.f32.partialorder %v2114_v38, 0.0  ;;  %v2232_v37 = vmul.f32 0.01, %v2114_v38 }
 0x279   : > { %2298 = vst.msk [vmem:[%s3858_s20 + $0x98] sm:$0xff] %vm2278_vm12, %v2265_v36  ;;  %v1553_v4 = vpop.permute.xlu1 %1552 }
 0x27a   : > { %v2264_v59 = vsel %vm2200_vm3, %v2114_v38, %v2232_v37  ;;  %v1521_v60 = vpop.permute.xlu0 %1520  ;;  %1618 = vst.msk [vmem:[#allocation2 + $0xf8] sm:$0xff] %vm1586_vm8, %v1553_v4 }
 0x27b   : > { %2297 = vst.msk [vmem:[%s3858_s20 + $0x90] sm:$0xff] %vm2278_vm12, %v2264_v59 }
 0x27c   : > { %1602 = vst.msk [vmem:[#allocation2 + $0x78] sm:$0xff] %vm1586_vm8, %v1521_v60 }
 0x27d   : > { %v1744_v12 = vpop.permute.xlu1 %1743 }
 0x27e   : > { %v1712_v27 = vpop.permute.xlu0 %1711  ;;  %1810 = vst.msk [vmem:[#allocation2 + $0xf0] sm:$0xff] %vm1779_vm9, %v1744_v12 }
 0x27f   : > { %1794 = vst.msk [vmem:[#allocation2 + $0x70] sm:$0xff] %vm1779_vm9, %v1712_v27 }
 0x281   : > { %v1746_v61 = vpop.permute.xlu1 %1745 }
 0x282   : > { %v1714_v63 = vpop.permute.xlu0 %1713  ;;  %1811 = vst.msk [vmem:[#allocation2 + $0xf8] sm:$0xff] %vm1779_vm9, %v1746_v61 }
 0x283   : > { %1795 = vst.msk [vmem:[#allocation2 + $0x78] sm:$0xff] %vm1779_vm9, %v1714_v63 }
 0x285   : > { %v1842_v49 = vld [vmem:[#allocation2 + $0xf0] sm:$0xff] }
 0x286   : > { %v1826_v26 = vld [vmem:[#allocation2 + $0x70] sm:$0xff]  ;;  %2731 = vmatprep.mubr.msk.f32.mxu1 %vm1856_vm10, %v1842_v49 }
 0x287   : > { %2707 = vmatprep.mubr.msk.f32.mxu0 %vm1856_vm10, %v1826_v26 }
 0x289   : > { %v1843_v46 = vld [vmem:[#allocation2 + $0xf8] sm:$0xff] }
 0x28a   : > { %v1827_v1 = vld [vmem:[#allocation2 + $0x78] sm:$0xff]  ;;  %2732 = vmatmul.mubr.msk.f32.gmra.mxu1 %vm1856_vm10, %v1843_v46 }
 0x28b   : > { %2708 = vmatmul.mubr.msk.f32.gmra.mxu0 %vm1856_vm10, %v1827_v1 }
 0x292   : > { %v2694_v18 = vpop.f32.mrf.mxu0 }
 0x293   : > { %v2049_v55 = vadd.f32 %v2694_v18, %v3849_v16 }
 0x294   : > { %v2043_v48 = vpop.f32.mrf.mxu0 }
 0x295   : > { %vm2187_vm4 = vcmp.ge.f32.partialorder %v2049_v55, 0.0  ;;  %v2219_v58 = vmul.f32 0.01, %v2049_v55  ;;  %v2044_v17 = vadd.f32 %v3849_v16, %v2043_v48 }
 0x297   : > { %v2718_v62 = vpop.f32.mrf.mxu1  ;;  %v2251_v23 = vsel %vm2187_vm4, %v2049_v55, %v2219_v58  ;;  %vm2186_vm5 = vcmp.ge.f32.partialorder %v2044_v17, 0.0  ;;  %v2218_v54 = vmul.f32 0.01, %v2044_v17 }
 0x298   : > { %v2129_v22 = vadd.f32 %v2718_v62, %v3849_v16  ;;  %2284 = vst.msk [vmem:[%s3858_s20 + $0x28] sm:$0xff] %vm2278_vm12, %v2251_v23 }
 0x299   : > { %v2123_v41 = vpop.f32.mrf.mxu1  ;;  %v2250_v7 = vsel %vm2186_vm5, %v2044_v17, %v2218_v54 }
 0x29a   : > { %vm2203_vm6 = vcmp.ge.f32.partialorder %v2129_v22, 0.0  ;;  %v2235_v40 = vmul.f32 0.01, %v2129_v22  ;;  %v2124_v29 = vadd.f32 %v3849_v16, %v2123_v41  ;;  %2283 = vst.msk [vmem:[%s3858_s20 + $0x20] sm:$0xff] %vm2278_vm12, %v2250_v7 }
 0x29c   : > { %v2267_v51 = vsel %vm2203_vm6, %v2129_v22, %v2235_v40  ;;  %vm2202_vm7 = vcmp.ge.f32.partialorder %v2124_v29, 0.0  ;;  %v2234_v50 = vmul.f32 0.01, %v2124_v29 }
 0x29d   : > { %2300 = vst.msk [vmem:[%s3858_s20 + $0xa8] sm:$0xff] %vm2278_vm12, %v2267_v51 }
 0x29e   : > { %v2266_v21 = vsel %vm2202_vm7, %v2124_v29, %v2234_v50 }
 0x29f   : > { %2299 = vst.msk [vmem:[%s3858_s20 + $0xa0] sm:$0xff] %vm2278_vm12, %v2266_v21 }
 0x2b6   : > { %v2697_v56 = vpop.f32.mrf.mxu0 }
 0x2b7   : > { %v2059_v6 = vadd.f32 %v2697_v56, %v3849_v16 }
 0x2b8   : > { %v2053_v57 = vpop.f32.mrf.mxu0 }
 0x2b9   : > { %vm2189_vm8 = vcmp.ge.f32.partialorder %v2059_v6, 0.0  ;;  %v2221_v28 = vmul.f32 0.01, %v2059_v6  ;;  %v2054_v31 = vadd.f32 %v3849_v16, %v2053_v57 }
 0x2bb   : > { %v2721_v0 = vpop.f32.mrf.mxu1  ;;  %v2253_v2 = vsel %vm2189_vm8, %v2059_v6, %v2221_v28  ;;  %vm2188_vm9 = vcmp.ge.f32.partialorder %v2054_v31, 0.0  ;;  %v2220_v32 = vmul.f32 0.01, %v2054_v31 }
 0x2bc   : > { %v2139_v33 = vadd.f32 %v2721_v0, %v3849_v16  ;;  %2286 = vst.msk [vmem:[%s3858_s20 + $0x38] sm:$0xff] %vm2278_vm12, %v2253_v2 }
 0x2bd   : > { %v2133_v34 = vpop.f32.mrf.mxu1  ;;  %v2252_v35 = vsel %vm2188_vm9, %v2054_v31, %v2220_v32 }
 0x2be   : > { %vm2205_vm10 = vcmp.ge.f32.partialorder %v2139_v33, 0.0  ;;  %v2237_v8 = vmul.f32 0.01, %v2139_v33  ;;  %v2134_v53 = vadd.f32 %v3849_v16, %v2133_v34  ;;  %2285 = vst.msk [vmem:[%s3858_s20 + $0x30] sm:$0xff] %vm2278_vm12, %v2252_v35 }
 0x2c0   : > { %v2269_v25 = vsel %vm2205_vm10, %v2139_v33, %v2237_v8  ;;  %vm2204_vm11 = vcmp.ge.f32.partialorder %v2134_v53, 0.0  ;;  %v2236_v9 = vmul.f32 0.01, %v2134_v53 }
 0x2c1   : > { %2302 = vst.msk [vmem:[%s3858_s20 + $0xb8] sm:$0xff] %vm2278_vm12, %v2269_v25 }
 0x2c2   : > { %v2268_v24 = vsel %vm2204_vm11, %v2134_v53, %v2236_v9 }
 0x2c3   : > { %2301 = vst.msk [vmem:[%s3858_s20 + $0xb0] sm:$0xff] %vm2278_vm12, %v2268_v24 }
 0x2de   : > { %v2724_v52 = vpop.f32.mrf.mxu1 }
 0x2df   : > { %v2700_v10 = vpop.f32.mrf.mxu0  ;;  %v2149_v45 = vadd.f32 %v2724_v52, %v3849_v16 }
 0x2e0   : > { %v2069_v11 = vadd.f32 %v2700_v10, %v3849_v16  ;;  %v2143_v43 = vpop.f32.mrf.mxu1 }
 0x2e1   : > { %v2063_v15 = vpop.f32.mrf.mxu0  ;;  %vm2207_vm14 = vcmp.ge.f32.partialorder %v2149_v45, 0.0  ;;  %v2239_v44 = vmul.f32 0.01, %v2149_v45  ;;  %v2144_v13 = vadd.f32 %v3849_v16, %v2143_v43 }
 0x2e2   : > { %vm2191_vm13 = vcmp.ge.f32.partialorder %v2069_v11, 0.0  ;;  %v2223_v42 = vmul.f32 0.01, %v2069_v11  ;;  %v2064_v14 = vadd.f32 %v3849_v16, %v2063_v15 }
 0x2e3   : > { %v2271_v20 = vsel %vm2207_vm14, %v2149_v45, %v2239_v44  ;;  %vm2206_vm0 = vcmp.ge.f32.partialorder %v2144_v13, 0.0  ;;  %v2238_v19 = vmul.f32 0.01, %v2144_v13 }
 0x2e4   : > { %v2255_v30 = vsel %vm2191_vm13, %v2069_v11, %v2223_v42  ;;  %2304 = vst.msk [vmem:[%s3858_s20 + $0xc8] sm:$0xff] %vm2278_vm12, %v2271_v20  ;;  %vm2190_vm15 = vcmp.ge.f32.partialorder %v2064_v14, 0.0  ;;  %v2222_v3 = vmul.f32 0.01, %v2064_v14 }
 0x2e5   : > { %2288 = vst.msk [vmem:[%s3858_s20 + $0x48] sm:$0xff] %vm2278_vm12, %v2255_v30  ;;  %v2270_v38 = vsel %vm2206_vm0, %v2144_v13, %v2238_v19 }
 0x2e6   : > { %v2254_v5 = vsel %vm2190_vm15, %v2064_v14, %v2222_v3  ;;  %2303 = vst.msk [vmem:[%s3858_s20 + $0xc0] sm:$0xff] %vm2278_vm12, %v2270_v38 }
 0x2e7   : > { %2287 = vst.msk [vmem:[%s3858_s20 + $0x40] sm:$0xff] %vm2278_vm12, %v2254_v5 }
 0x306   : > { %v2727_v47 = vpop.f32.mrf.mxu1 }
 0x307   : > { %v2703_v39 = vpop.f32.mrf.mxu0  ;;  %v2159_v37 = vadd.f32 %v2727_v47, %v3849_v16 }
 0x308   : > { %v2079_v36 = vadd.f32 %v2703_v39, %v3849_v16  ;;  %v2153_v4 = vpop.f32.mrf.mxu1 }
 0x309   : > { %v2073_v59 = vpop.f32.mrf.mxu0  ;;  %vm2209_vm2 = vcmp.ge.f32.partialorder %v2159_v37, 0.0  ;;  %v2241_v12 = vmul.f32 0.01, %v2159_v37  ;;  %v2154_v61 = vadd.f32 %v3849_v16, %v2153_v4 }
 0x30a   : > { %vm2193_vm1 = vcmp.ge.f32.partialorder %v2079_v36, 0.0  ;;  %v2225_v60 = vmul.f32 0.01, %v2079_v36  ;;  %v2074_v27 = vadd.f32 %v3849_v16, %v2073_v59 }
 0x30b   : > { %v2273_v26 = vsel %vm2209_vm2, %v2159_v37, %v2241_v12  ;;  %vm2208_vm4 = vcmp.ge.f32.partialorder %v2154_v61, 0.0  ;;  %v2240_v1 = vmul.f32 0.01, %v2154_v61 }
 0x30c   : > { %v2257_v63 = vsel %vm2193_vm1, %v2079_v36, %v2225_v60  ;;  %2306 = vst.msk [vmem:[%s3858_s20 + $0xd8] sm:$0xff] %vm2278_vm12, %v2273_v26  ;;  %vm2192_vm3 = vcmp.ge.f32.partialorder %v2074_v27, 0.0  ;;  %v2224_v49 = vmul.f32 0.01, %v2074_v27 }
 0x30d   : > { %2290 = vst.msk [vmem:[%s3858_s20 + $0x58] sm:$0xff] %vm2278_vm12, %v2257_v63  ;;  %v2272_v18 = vsel %vm2208_vm4, %v2154_v61, %v2240_v1 }
 0x30e   : > { %v2256_v46 = vsel %vm2192_vm3, %v2074_v27, %v2224_v49  ;;  %2305 = vst.msk [vmem:[%s3858_s20 + $0xd0] sm:$0xff] %vm2278_vm12, %v2272_v18 }
 0x30f   : > { %2289 = vst.msk [vmem:[%s3858_s20 + $0x50] sm:$0xff] %vm2278_vm12, %v2256_v46 }
 0x32e   : > { %v2730_v48 = vpop.f32.mrf.mxu1 }
 0x32f   : > { %v2706_v55 = vpop.f32.mrf.mxu0  ;;  %v2169_v17 = vadd.f32 %v2730_v48, %v3849_v16 }
 0x330   : > { %v2089_v58 = vadd.f32 %v2706_v55, %v3849_v16  ;;  %v2163_v23 = vpop.f32.mrf.mxu1 }
 0x331   : > { %v2083_v62 = vpop.f32.mrf.mxu0  ;;  %vm2211_vm6 = vcmp.ge.f32.partialorder %v2169_v17, 0.0  ;;  %v2243_v22 = vmul.f32 0.01, %v2169_v17  ;;  %v2164_v7 = vadd.f32 %v3849_v16, %v2163_v23 }
 0x332   : > { %vm2195_vm5 = vcmp.ge.f32.partialorder %v2089_v58, 0.0  ;;  %v2227_v54 = vmul.f32 0.01, %v2089_v58  ;;  %v2084_v41 = vadd.f32 %v3849_v16, %v2083_v62 }
 0x333   : > { %v2275_v29 = vsel %vm2211_vm6, %v2169_v17, %v2243_v22  ;;  %vm2210_vm8 = vcmp.ge.f32.partialorder %v2164_v7, 0.0  ;;  %v2242_v50 = vmul.f32 0.01, %v2164_v7 }
 0x334   : > { %v2259_v40 = vsel %vm2195_vm5, %v2089_v58, %v2227_v54  ;;  %2308 = vst.msk [vmem:[%s3858_s20 + $0xe8] sm:$0xff] %vm2278_vm12, %v2275_v29  ;;  %vm2194_vm7 = vcmp.ge.f32.partialorder %v2084_v41, 0.0  ;;  %v2226_v51 = vmul.f32 0.01, %v2084_v41 }
 0x335   : > { %2292 = vst.msk [vmem:[%s3858_s20 + $0x68] sm:$0xff] %vm2278_vm12, %v2259_v40  ;;  %v2274_v56 = vsel %vm2210_vm8, %v2164_v7, %v2242_v50 }
 0x336   : > { %v2258_v21 = vsel %vm2194_vm7, %v2084_v41, %v2226_v51  ;;  %2307 = vst.msk [vmem:[%s3858_s20 + $0xe0] sm:$0xff] %vm2278_vm12, %v2274_v56 }
 0x337   : > { %2291 = vst.msk [vmem:[%s3858_s20 + $0x60] sm:$0xff] %vm2278_vm12, %v2258_v21 }
 0x34a   : > { %v2733_v57 = vpop.f32.mrf.mxu1 }
 0x34b   : > { %v2709_v6 = vpop.f32.mrf.mxu0  ;;  %v2179_v31 = vadd.f32 %v2733_v57, %v3849_v16 }
 0x34c   : > { %v2099_v28 = vadd.f32 %v2709_v6, %v3849_v16  ;;  %v2173_v2 = vpop.f32.mrf.mxu1 }
 0x34d   : > { %v2093_v0 = vpop.f32.mrf.mxu0  ;;  %vm2213_vm10 = vcmp.ge.f32.partialorder %v2179_v31, 0.0  ;;  %v2245_v33 = vmul.f32 0.01, %v2179_v31  ;;  %v2174_v35 = vadd.f32 %v3849_v16, %v2173_v2 }
 0x34e   : > { %vm2197_vm9 = vcmp.ge.f32.partialorder %v2099_v28, 0.0  ;;  %v2229_v32 = vmul.f32 0.01, %v2099_v28  ;;  %v2094_v34 = vadd.f32 %v3849_v16, %v2093_v0 }
 0x34f   : > { %v2277_v53 = vsel %vm2213_vm10, %v2179_v31, %v2245_v33  ;;  %vm2212_vm13 = vcmp.ge.f32.partialorder %v2174_v35, 0.0  ;;  %v2244_v9 = vmul.f32 0.01, %v2174_v35 }
 0x350   : > { %v2261_v8 = vsel %vm2197_vm9, %v2099_v28, %v2229_v32  ;;  %2310 = vst.msk [vmem:[%s3858_s20 + $0xf8] sm:$0xff] %vm2278_vm12, %v2277_v53  ;;  %vm2196_vm11 = vcmp.ge.f32.partialorder %v2094_v34, 0.0  ;;  %v2228_v25 = vmul.f32 0.01, %v2094_v34 }
 0x351   : > { %2294 = vst.msk [vmem:[%s3858_s20 + $0x78] sm:$0xff] %vm2278_vm12, %v2261_v8  ;;  %v2276_v10 = vsel %vm2212_vm13, %v2174_v35, %v2244_v9 }
 0x352   : > { %v2260_v24 = vsel %vm2196_vm11, %v2094_v34, %v2228_v25  ;;  %2309 = vst.msk [vmem:[%s3858_s20 + $0xf0] sm:$0xff] %vm2278_vm12, %v2276_v10 }
 0x353   : > { %2293 = vst.msk [vmem:[%s3858_s20 + $0x70] sm:$0xff] %vm2278_vm12, %v2260_v24 }
 0x354 PF: > { %s13_s14 = sadd.s32 1, %s2799_s14   ;;  %s4031_s12 = smov %s2795_s13 }
 0x355   : > { %p10_p5 = scmp.ge.s32.totalorder %s13_s14, 4   ;;  %s4032_s13 = smov %s4034_s15 }
 0x357   :  { %12 = sbr.rel (!%p10_p5) target bundleno = 2 (0x2), region = 65 }

</bundles_post_ra>
